<compile_context>
chip_gen: v7x
topology: tpu7x:2x2x1
jax: 0.10.0
libtpu: 0.0.40
codegen_flags: <defaults>
</compile_context>

<pallas_src>
import functools

import jax
import jax.numpy as jnp
import numpy as np
from jax import lax
from jax.experimental import pallas as pl
from jax.experimental.pallas import tpu as pltpu

NEG_SLOPE = 0.2   # nn.LeakyReLU(0.2)
BN_EPS = 1e-5     # nn.BatchNorm2d default eps


# ---------------------------------------------------------------------------
# Per-generation tuning
# ---------------------------------------------------------------------------
def _device_kind():
    try:
        return jax.devices()[0].device_kind.lower()
    except Exception:
        return ""


_KIND = _device_kind()
# tn=256 feeds the full 256-wide MXU on v6e/v7x; keep 128 on v5-class chips.
TN_TARGET = 128 if "v5" in _KIND else 256
# v7x has only 64 MiB physical VMEM; leave headroom there.
if "v7" in _KIND:
    _VMEM_LIMIT = 48 * 1024 * 1024
elif "v6" in _KIND or "v5" in _KIND:
    _VMEM_LIMIT = 64 * 1024 * 1024
else:
    _VMEM_LIMIT = 32 * 1024 * 1024


def _compiler_params():
    return pltpu.CompilerParams(dimension_semantics=("parallel", "parallel"),
                                vmem_limit_bytes=_VMEM_LIMIT)


def _choose_cout_tiling(cout):
    """Pick (padded cout, lane tile) — avoid padding whenever legal."""
    if cout % 128 == 0:
        tn = TN_TARGET if cout % TN_TARGET == 0 else 128
        return cout, tn
    if cout >= 8:
        return cout, cout          # full-dim lane block (masked stores, no pad)
    return 128, 128                # tiny head (final Cout=1): one 128-lane tile


# ---------------------------------------------------------------------------
# Pallas kernels
# ---------------------------------------------------------------------------
def _conv_kernel(x_ref, w_ref, y_ref, acc_ref, *, khs, wo, m, fuse_leaky):
    """Implicit conv: khs shifted matmuls from contiguous row windows."""
    acc_ref[...] = jnp.dot(x_ref[pl.ds(0, m), :], w_ref[0],
                           preferred_element_type=jnp.float32)
    for a in range(1, khs):
        acc_ref[...] += jnp.dot(x_ref[pl.ds(a * wo, m), :], w_ref[a],
                                preferred_element_type=jnp.float32)
    y = acc_ref[...]
    if fuse_leaky:
        y = jnp.where(y >= 0, y, NEG_SLOPE * y)
    y_ref[...] = y.astype(y_ref.dtype)


def _conv_stats_kernel(x_ref, w_ref, y_ref, s_ref, ss_ref, acc_ref,
                       *, khs, wo, m):
    """Implicit conv + per-(image, channel) sum / sum-of-squares from f32 acc."""
    acc_ref[...] = jnp.dot(x_ref[pl.ds(0, m), :], w_ref[0],
                           preferred_element_type=jnp.float32)
    for a in range(1, khs):
        acc_ref[...] += jnp.dot(x_ref[pl.ds(a * wo, m), :], w_ref[a],
                                preferred_element_type=jnp.float32)
    y = acc_ref[...]
    y_ref[...] = y.astype(y_ref.dtype)                      # bf16 pre-BN act
    s_ref[...] = jnp.sum(y, axis=0, keepdims=True)          # exact f32 stats
    ss_ref[...] = jnp.sum(y * y, axis=0, keepdims=True)


def _bn_leaky_kernel(y_ref, scale_ref, shift_ref, o_ref):
    """Per-channel affine (folded BN) + LeakyReLU, bf16 in / bf16 out."""
    z = y_ref[...].astype(jnp.float32) * scale_ref[...] + shift_ref[...]
    o_ref[...] = jnp.where(z >= 0, z, NEG_SLOPE * z).astype(o_ref.dtype)


# ---------------------------------------------------------------------------
# pallas_call wrappers
# ---------------------------------------------------------------------------
def conv_layer(x2, wmat, dims, *, fuse_leaky, with_stats, out_dtype):
    n, r_in, k = x2.shape
    khs = wmat.shape[0]
    m, wo = dims["M"], dims["Wo"]
    cpad, tn = dims["cpad"], dims["tn"]
    grid = (n, cpad // tn)

    x_spec = pl.BlockSpec((None, r_in, k), lambda i, j: (i, 0, 0))
    w_spec = pl.BlockSpec((khs, k, tn), lambda i, j: (0, 0, j))
    y_spec = pl.BlockSpec((None, m, tn), lambda i, j: (i, 0, j))
    scratch = [pltpu.VMEM((m, tn), jnp.float32)]

    if with_stats:
        kern = functools.partial(_conv_stats_kernel, khs=khs, wo=wo, m=m)
        out_shape = (jax.ShapeDtypeStruct((n, m, cpad), out_dtype),
                     jax.ShapeDtypeStruct((n, 1, cpad), jnp.float32),
                     jax.ShapeDtypeStruct((n, 1, cpad), jnp.float32))
        out_specs = (y_spec,
                     pl.BlockSpec((None, 1, tn), lambda i, j: (i, 0, j)),
                     pl.BlockSpec((None, 1, tn), lambda i, j: (i, 0, j)))
    else:
        kern = functools.partial(_conv_kernel, khs=khs, wo=wo, m=m,
                                 fuse_leaky=fuse_leaky)
        out_shape = jax.ShapeDtypeStruct((n, m, cpad), out_dtype)
        out_specs = y_spec

    return pl.pallas_call(
        kern,
        out_shape=out_shape,
        grid_spec=pltpu.PrefetchScalarGridSpec(
            num_scalar_prefetch=0,
            grid=grid,
            in_specs=[x_spec, w_spec],
            out_specs=out_specs,
            scratch_shapes=scratch),
        compiler_params=_compiler_params(),
    )(x2, wmat)


def bn_leaky_apply(y, scale, shift, dims, out_dtype=jnp.bfloat16):
    n, m, cpad = y.shape
    tn = dims["tn"]
    grid = (n, cpad // tn)
    return pl.pallas_call(
        _bn_leaky_kernel,
        out_shape=jax.ShapeDtypeStruct((n, m, cpad), out_dtype),
        grid_spec=pltpu.PrefetchScalarGridSpec(
            num_scalar_prefetch=0,
            grid=grid,
            in_specs=[pl.BlockSpec((None, m, tn), lambda i, j: (i, 0, j)),
                      pl.BlockSpec((1, tn), lambda i, j: (0, j)),
                      pl.BlockSpec((1, tn), lambda i, j: (0, j))],
            out_specs=pl.BlockSpec((None, m, tn), lambda i, j: (i, 0, j))),
        compiler_params=_compiler_params(),
    )(y, scale, shift)


# ---------------------------------------------------------------------------
# Glue: space-to-depth + width-tap fold, weight repack, parameter init
# ---------------------------------------------------------------------------
def _prep_conv(h, w, stride, pad):
    """NHWC activation -> x2[n, (Ho+khs-1)*Wo, kws*s*s*Cin] and matching weights.

    Conv(kh,kw,stride s) becomes khs = kh//s shifted matmuls over contiguous
    row windows of x2 (the width taps / stride phases are folded into the
    contraction axis by the XLA transform below)."""
    cout, cin, kh, kw = w.shape
    n, H, W, C = h.shape
    assert C == cin
    s = stride
    Hp, Wp = H + 2 * pad, W + 2 * pad
    assert kh % s == 0 and kw % s == 0 and Hp % s == 0 and Wp % s == 0
    Qh, Qw = Hp // s, Wp // s
    khs, kws = kh // s, kw // s
    Ho, Wo = Qh - khs + 1, Qw - kws + 1

    xp = jnp.pad(h, ((0, 0), (pad, pad), (pad, pad), (0, 0))) if pad else h
    # space-to-depth by the stride: ph[n,q,r,b,b2,c] = xp[n, s*q+b, s*r+b2, c]
    ph = xp.reshape(n, Qh, s, Qw, s, C).transpose(0, 1, 3, 2, 4, 5)
    # fold the width-direction taps into the contraction axis
    xw = jnp.stack([ph[:, :, a2:a2 + Wo] for a2 in range(kws)], axis=3)
    K = kws * s * s * C
    x2 = xw.reshape(n, Qh * Wo, K).astype(jnp.bfloat16)

    # OIHW -> [khs, (kws, b, b2, cin), cout] to match x2's contraction order.
    wt = jnp.transpose(w, (2, 3, 1, 0)).reshape(khs, s, kws, s, cin, cout)
    wmat = jnp.transpose(wt, (0, 2, 1, 3, 4, 5)).reshape(khs, K, cout)
    cpad, tn = _choose_cout_tiling(cout)
    if cpad != cout:
        wmat = jnp.pad(wmat, ((0, 0), (0, 0), (0, cpad - cout)))
    wmat = wmat.astype(jnp.bfloat16)

    dims = dict(Ho=Ho, Wo=Wo, M=Ho * Wo, cout=cout, cpad=cpad, tn=tn)
    return x2, wmat, dims


def _pad_channels(v, cpad):
    v = v.astype(jnp.float32)
    return v if v.shape[0] == cpad else jnp.pad(v, (0, cpad - v.shape[0]))


def init_discriminator(key, img_size, ndf, kd, nc):
    """Same layer stack / shapes as Discriminator.__init__ (bias-free convs).

    Returns (static layer configs, array-only weight pytree)."""
    blocks = int(np.log2(img_size)) - 3
    cfgs, weights = [], []

    key, k = jax.random.split(key)
    cfgs.append(("conv_leaky", 2, 1))
    weights.append({"w": 0.02 * jax.random.normal(k, (ndf, nc, kd, kd),
                                                  jnp.float32)})

    for i in range(blocks):
        f_in = min(ndf * 2 ** i, 512)
        f_out = min(ndf * 2 ** (i + 1), 512)
        key, kw_, kg, kb = jax.random.split(key, 4)
        cfgs.append(("conv_bn_leaky", 2, 1))
        weights.append({
            "w": 0.02 * jax.random.normal(kw_, (f_out, f_in, kd, kd), jnp.float32),
            "gamma": 1.0 + 0.1 * jax.random.normal(kg, (f_out,), jnp.float32),
            "beta": 0.1 * jax.random.normal(kb, (f_out,), jnp.float32)})

    f_in = min(ndf * 2 ** blocks, 512)
    key, k = jax.random.split(key)
    cfgs.append(("conv", 1, 0))
    weights.append({"w": 0.02 * jax.random.normal(k, (1, f_in, kd, kd),
                                                  jnp.float32)})
    return tuple(cfgs), weights


# ---------------------------------------------------------------------------
# Forward pass
# ---------------------------------------------------------------------------
def discriminator_forward(cfgs, weights, x):
    """x: [N, nc, img, img] NCHW -> [N, 1, 1, 1]."""
    n = x.shape[0]
    h = jnp.transpose(x, (0, 2, 3, 1)).astype(jnp.bfloat16)     # NCHW -> NHWC
    for (kind, stride, pad), wd in zip(cfgs, weights):
        x2, wmat, dims = _prep_conv(h, wd["w"], stride, pad)
        if kind == "conv_bn_leaky":
            y, s, ss = conv_layer(x2, wmat, dims, fuse_leaky=False,
                                  with_stats=True, out_dtype=jnp.bfloat16)
            cpad = dims["cpad"]
            count = float(n * dims["M"])
            tot = jnp.sum(s, axis=0).reshape(cpad)
            tot2 = jnp.sum(ss, axis=0).reshape(cpad)
            mean = tot / count
            # Clamp to guard the E[x^2]-E[x]^2 cancellation (biased variance,
            # training-mode batch stats, matching the reference).
            var = jnp.maximum(tot2 / count - mean * mean, 0.0)
            rstd = lax.rsqrt(var + BN_EPS)
            gamma = _pad_channels(wd["gamma"], cpad)
            beta = _pad_channels(wd["beta"], cpad)
            scale = (gamma * rstd).reshape(1, cpad)
            shift = (beta - mean * gamma * rstd).reshape(1, cpad)
            y = bn_leaky_apply(y, scale, shift, dims)
        elif kind == "conv_leaky":
            y = conv_layer(x2, wmat, dims, fuse_leaky=True,
                           with_stats=False, out_dtype=jnp.bfloat16)
        else:  # final conv: no BN, no activation
            y = conv_layer(x2, wmat, dims, fuse_leaky=False,
                           with_stats=False, out_dtype=jnp.float32)
        if dims["cpad"] != dims["cout"]:
            y = y[:, :, :dims["cout"]]
        h = y.reshape(n, dims["Ho"], dims["Wo"], dims["cout"])
    return jnp.transpose(h, (0, 3, 1, 2)).astype(jnp.float32)   # back to NCHW


# ---------------------------------------------------------------------------
# Pure-JAX reference (bf16-consistent lax.conv) for a correctness check
# ---------------------------------------------------------------------------
def reference_forward(cfgs, weights, x):
    h = x
    for (kind, stride, pad), wd in zip(cfgs, weights):
        y = lax.conv_general_dilated(
            h.astype(jnp.bfloat16), wd["w"].astype(jnp.bfloat16),
            (stride, stride), [(pad, pad), (pad, pad)],
            dimension_numbers=("NCHW", "OIHW", "NCHW"),
            preferred_element_type=jnp.float32)
        if kind == "conv_bn_leaky":
            mean = jnp.mean(y, axis=(0, 2, 3), keepdims=True)
            var = jnp.mean(jnp.square(y - mean), axis=(0, 2, 3), keepdims=True)
            y = (y - mean) * lax.rsqrt(var + BN_EPS)
            y = (y * wd["gamma"].reshape(1, -1, 1, 1)
                 + wd["beta"].reshape(1, -1, 1, 1))
        if kind in ("conv_leaky", "conv_bn_leaky"):
            y = jnp.where(y >= 0, y, NEG_SLOPE * y)
        h = y
    return h


if __name__ == "__main__":
    # Small config: img_size=32 -> blocks = log2(32) - 3 = 2:
    #   Conv(3->16,s2)+LReLU -> Conv(16->32,s2)+BN+LReLU
    #   -> Conv(32->64,s2)+BN+LReLU -> Conv(64->1,k4,s1,p0)
    IMG, NDF, KD, NC, BATCH = 32, 16, 4, 3, 2

    key = jax.random.PRNGKey(0)
    key, kx = jax.random.split(key)
    x = jax.random.normal(kx, (BATCH, NC, IMG, IMG), jnp.float32)
    cfgs, weights = init_discriminator(key, IMG, NDF, KD, NC)

    fwd = jax.jit(functools.partial(discriminator_forward, cfgs))
    out = jax.block_until_ready(fwd(weights, x))
    ref = jax.block_until_ready(reference_forward(cfgs, weights, x))

    assert out.shape == (BATCH, 1, 1, 1), out.shape
    np.testing.assert_allclose(np.asarray(out, dtype=np.float32),
                               np.asarray(ref, dtype=np.float32),
                               rtol=2e-2, atol=2e-2)
    print("KERNEL_OK")
</pallas_src>

<mosaic_0001>
module attributes {stable_mosaic.version = 11 : i64} {
  func.func @_conv_kernel(%arg0: i32, %arg1: i32, %arg2: memref<1x272x24xbf16, #tpu.memory_space<vmem>>, %arg3: memref<2x24x16xbf16, #tpu.memory_space<vmem>>, %arg4: memref<1x256x16xbf16, #tpu.memory_space<vmem>>, %arg5: memref<256x16xf32, #tpu.memory_space<vmem>>) attributes {dimension_semantics = [#tpu.dimension_semantics<parallel>, #tpu.dimension_semantics<parallel>], iteration_bounds = array<i64: 2, 1>, scalar_prefetch = 0 : i64, scratch_operands = 1 : i64, tpu.core_type = #tpu.core_type<tc>, window_params = [{transform_indices = @transform_0, window_bounds = array<i64: 1, 272, 24>}, {transform_indices = @transform_1, window_bounds = array<i64: 2, 24, 16>}, {transform_indices = @transform_2, window_bounds = array<i64: 1, 256, 16>}]} {
    %c0 = arith.constant 0 : index
    %c0_0 = arith.constant 0 : index
    %c0_1 = arith.constant 0 : index
    %0 = vector.load %arg2[%c0, %c0_0, %c0_1] : memref<1x272x24xbf16, #tpu.memory_space<vmem>>, vector<1x256x24xbf16>
    %1 = vector.shape_cast %0 : vector<1x256x24xbf16> to vector<256x24xbf16>
    %c0_2 = arith.constant 0 : index
    %c0_3 = arith.constant 0 : index
    %c0_4 = arith.constant 0 : index
    %2 = vector.load %arg3[%c0_2, %c0_3, %c0_4] : memref<2x24x16xbf16, #tpu.memory_space<vmem>>, vector<1x24x16xbf16>
    %3 = vector.shape_cast %2 : vector<1x24x16xbf16> to vector<24x16xbf16>
    %cst = arith.constant dense<0.000000e+00> : vector<256x16xf32>
    %4 = tpu.matmul %1, %3, %cst {dimension_numbers = #tpu.dot_dimension_numbers<[1], [0], [0], [1], [0, 0, 1, 1], [], []>} : vector<256x24xbf16>, vector<24x16xbf16>, vector<256x16xf32> -> vector<256x16xf32>
    %c0_5 = arith.constant 0 : index
    %c0_6 = arith.constant 0 : index
    %5 = vector.load %arg5[%c0_5, %c0_6] : memref<256x16xf32, #tpu.memory_space<vmem>>, vector<256x16xf32>
    tpu.vector_store %arg5[%c0_5, %c0_6], %4 {strides = array<i32>} : memref<256x16xf32, #tpu.memory_space<vmem>>, vector<256x16xf32>,
    %c0_7 = arith.constant 0 : index
    %c0_8 = arith.constant 0 : index
    %6 = vector.load %arg5[%c0_7, %c0_8] : memref<256x16xf32, #tpu.memory_space<vmem>>, vector<256x16xf32>
    %c0_9 = arith.constant 0 : index
    %c16 = arith.constant 16 : index
    %c0_10 = arith.constant 0 : index
    %7 = vector.load %arg2[%c0_9, %c16, %c0_10] : memref<1x272x24xbf16, #tpu.memory_space<vmem>>, vector<1x256x24xbf16>
    %8 = vector.shape_cast %7 : vector<1x256x24xbf16> to vector<256x24xbf16>
    %c1 = arith.constant 1 : index
    %c0_11 = arith.constant 0 : index
    %c0_12 = arith.constant 0 : index
    %9 = vector.load %arg3[%c1, %c0_11, %c0_12] : memref<2x24x16xbf16, #tpu.memory_space<vmem>>, vector<1x24x16xbf16>
    %10 = vector.shape_cast %9 : vector<1x24x16xbf16> to vector<24x16xbf16>
    %cst_13 = arith.constant dense<0.000000e+00> : vector<256x16xf32>
    %11 = tpu.matmul %8, %10, %cst_13 {dimension_numbers = #tpu.dot_dimension_numbers<[1], [0], [0], [1], [0, 0, 1, 1], [], []>} : vector<256x24xbf16>, vector<24x16xbf16>, vector<256x16xf32> -> vector<256x16xf32>
    %12 = arith.addf %6, %11 : vector<256x16xf32>
    %c0_14 = arith.constant 0 : index
    %c0_15 = arith.constant 0 : index
    %13 = vector.load %arg5[%c0_14, %c0_15] : memref<256x16xf32, #tpu.memory_space<vmem>>, vector<256x16xf32>
    tpu.vector_store %arg5[%c0_14, %c0_15], %12 {strides = array<i32>} : memref<256x16xf32, #tpu.memory_space<vmem>>, vector<256x16xf32>,
    %c0_16 = arith.constant 0 : index
    %c0_17 = arith.constant 0 : index
    %14 = vector.load %arg5[%c0_16, %c0_17] : memref<256x16xf32, #tpu.memory_space<vmem>>, vector<256x16xf32>
    %cst_18 = arith.constant 0.000000e+00 : f32
    %15 = vector.broadcast %cst_18 : f32 to vector<256x16xf32>
    %16 = arith.cmpf oge, %14, %15 : vector<256x16xf32>
    %cst_19 = arith.constant 2.000000e-01 : f32
    %17 = vector.broadcast %cst_19 : f32 to vector<256x16xf32>
    %18 = arith.mulf %17, %14 : vector<256x16xf32>
    %19 = arith.select %16, %14, %18 : vector<256x16xi1>, vector<256x16xf32>
    %20 = arith.truncf %19 : vector<256x16xf32> to vector<256x16xbf16>
    %c0_20 = arith.constant 0 : index
    %c0_21 = arith.constant 0 : index
    %c0_22 = arith.constant 0 : index
    %21 = vector.load %arg4[%c0_20, %c0_21, %c0_22] : memref<1x256x16xbf16, #tpu.memory_space<vmem>>, vector<1x256x16xbf16>
    %22 = vector.shape_cast %21 : vector<1x256x16xbf16> to vector<256x16xbf16>
    %23 = vector.shape_cast %20 : vector<256x16xbf16> to vector<1x256x16xbf16>
    tpu.vector_store %arg4[%c0_20, %c0_21, %c0_22], %23 {strides = array<i32>} : memref<1x256x16xbf16, #tpu.memory_space<vmem>>, vector<1x256x16xbf16>,
    return
  }
  func.func @transform_0(%arg0: i32, %arg1: i32) -> (i32, i32, i32) {
    %c0_i32 = arith.constant 0 : i32
    %c0_i32_0 = arith.constant 0 : i32
    %c0_i32_1 = arith.constant 0 : i32
    return %arg0, %c0_i32, %c0_i32_0 : i32, i32, i32
  }
  func.func @transform_1(%arg0: i32, %arg1: i32) -> (i32, i32, i32) {
    %c0_i32 = arith.constant 0 : i32
    %c0_i32_0 = arith.constant 0 : i32
    %c0_i32_1 = arith.constant 0 : i32
    return %c0_i32, %c0_i32_0, %arg1 : i32, i32, i32
  }
  func.func @transform_2(%arg0: i32, %arg1: i32) -> (i32, i32, i32) {
    %c0_i32 = arith.constant 0 : i32
    %c0_i32_0 = arith.constant 0 : i32
    return %arg0, %c0_i32, %arg1 : i32, i32, i32
  }
}

module attributes {stable_mosaic.version = 11 : i64} {
  func.func @_conv_stats_kernel(%arg0: i32, %arg1: i32, %arg2: memref<1x72x128xbf16, #tpu.memory_space<vmem>>, %arg3: memref<2x128x32xbf16, #tpu.memory_space<vmem>>, %arg4: memref<1x64x32xbf16, #tpu.memory_space<vmem>>, %arg5: memref<1x1x32xf32, #tpu.memory_space<vmem>>, %arg6: memref<1x1x32xf32, #tpu.memory_space<vmem>>, %arg7: memref<64x32xf32, #tpu.memory_space<vmem>>) attributes {dimension_semantics = [#tpu.dimension_semantics<parallel>, #tpu.dimension_semantics<parallel>], iteration_bounds = array<i64: 2, 1>, scalar_prefetch = 0 : i64, scratch_operands = 1 : i64, tpu.core_type = #tpu.core_type<tc>, window_params = [{transform_indices = @transform_0, window_bounds = array<i64: 1, 72, 128>}, {transform_indices = @transform_1, window_bounds = array<i64: 2, 128, 32>}, {transform_indices = @transform_2, window_bounds = array<i64: 1, 64, 32>}, {transform_indices = @transform_3, window_bounds = array<i64: 1, 1, 32>}, {transform_indices = @transform_4, window_bounds = array<i64: 1, 1, 32>}]} {
    %c0 = arith.constant 0 : index
    %c0_0 = arith.constant 0 : index
    %c0_1 = arith.constant 0 : index
    %0 = vector.load %arg2[%c0, %c0_0, %c0_1] : memref<1x72x128xbf16, #tpu.memory_space<vmem>>, vector<1x64x128xbf16>
    %1 = vector.shape_cast %0 : vector<1x64x128xbf16> to vector<64x128xbf16>
    %c0_2 = arith.constant 0 : index
    %c0_3 = arith.constant 0 : index
    %c0_4 = arith.constant 0 : index
    %2 = vector.load %arg3[%c0_2, %c0_3, %c0_4] : memref<2x128x32xbf16, #tpu.memory_space<vmem>>, vector<1x128x32xbf16>
    %3 = vector.shape_cast %2 : vector<1x128x32xbf16> to vector<128x32xbf16>
    %cst = arith.constant dense<0.000000e+00> : vector<64x32xf32>
    %4 = tpu.matmul %1, %3, %cst {dimension_numbers = #tpu.dot_dimension_numbers<[1], [0], [0], [1], [0, 0, 1, 1], [], []>} : vector<64x128xbf16>, vector<128x32xbf16>, vector<64x32xf32> -> vector<64x32xf32>
    %c0_5 = arith.constant 0 : index
    %c0_6 = arith.constant 0 : index
    %5 = vector.load %arg7[%c0_5, %c0_6] : memref<64x32xf32, #tpu.memory_space<vmem>>, vector<64x32xf32>
    tpu.vector_store %arg7[%c0_5, %c0_6], %4 {strides = array<i32>} : memref<64x32xf32, #tpu.memory_space<vmem>>, vector<64x32xf32>,
    %c0_7 = arith.constant 0 : index
    %c0_8 = arith.constant 0 : index
    %6 = vector.load %arg7[%c0_7, %c0_8] : memref<64x32xf32, #tpu.memory_space<vmem>>, vector<64x32xf32>
    %c0_9 = arith.constant 0 : index
    %c8 = arith.constant 8 : index
    %c0_10 = arith.constant 0 : index
    %7 = vector.load %arg2[%c0_9, %c8, %c0_10] : memref<1x72x128xbf16, #tpu.memory_space<vmem>>, vector<1x64x128xbf16>
    %8 = vector.shape_cast %7 : vector<1x64x128xbf16> to vector<64x128xbf16>
    %c1 = arith.constant 1 : index
    %c0_11 = arith.constant 0 : index
    %c0_12 = arith.constant 0 : index
    %9 = vector.load %arg3[%c1, %c0_11, %c0_12] : memref<2x128x32xbf16, #tpu.memory_space<vmem>>, vector<1x128x32xbf16>
    %10 = vector.shape_cast %9 : vector<1x128x32xbf16> to vector<128x32xbf16>
    %cst_13 = arith.constant dense<0.000000e+00> : vector<64x32xf32>
    %11 = tpu.matmul %8, %10, %cst_13 {dimension_numbers = #tpu.dot_dimension_numbers<[1], [0], [0], [1], [0, 0, 1, 1], [], []>} : vector<64x128xbf16>, vector<128x32xbf16>, vector<64x32xf32> -> vector<64x32xf32>
    %12 = arith.addf %6, %11 : vector<64x32xf32>
    %c0_14 = arith.constant 0 : index
    %c0_15 = arith.constant 0 : index
    %13 = vector.load %arg7[%c0_14, %c0_15] : memref<64x32xf32, #tpu.memory_space<vmem>>, vector<64x32xf32>
    tpu.vector_store %arg7[%c0_14, %c0_15], %12 {strides = array<i32>} : memref<64x32xf32, #tpu.memory_space<vmem>>, vector<64x32xf32>,
    %c0_16 = arith.constant 0 : index
    %c0_17 = arith.constant 0 : index
    %14 = vector.load %arg7[%c0_16, %c0_17] : memref<64x32xf32, #tpu.memory_space<vmem>>, vector<64x32xf32>
    %15 = arith.truncf %14 : vector<64x32xf32> to vector<64x32xbf16>
    %c0_18 = arith.constant 0 : index
    %c0_19 = arith.constant 0 : index
    %c0_20 = arith.constant 0 : index
    %16 = vector.load %arg4[%c0_18, %c0_19, %c0_20] : memref<1x64x32xbf16, #tpu.memory_space<vmem>>, vector<1x64x32xbf16>
    %17 = vector.shape_cast %16 : vector<1x64x32xbf16> to vector<64x32xbf16>
    %18 = vector.shape_cast %15 : vector<64x32xbf16> to vector<1x64x32xbf16>
    tpu.vector_store %arg4[%c0_18, %c0_19, %c0_20], %18 {strides = array<i32>} : memref<1x64x32xbf16, #tpu.memory_space<vmem>>, vector<1x64x32xbf16>,
    %cst_21 = arith.constant dense<0.000000e+00> : vector<32xf32>
    %19 = vector.multi_reduction <add>, %14, %cst_21 [0] : vector<64x32xf32> to vector<32xf32>
    %20 = vector.shape_cast %19 : vector<32xf32> to vector<1x32xf32>
    %c0_22 = arith.constant 0 : index
    %c0_23 = arith.constant 0 : index
    %c0_24 = arith.constant 0 : index
    %21 = vector.load %arg5[%c0_22, %c0_23, %c0_24] : memref<1x1x32xf32, #tpu.memory_space<vmem>>, vector<1x1x32xf32>
    %22 = vector.shape_cast %21 : vector<1x1x32xf32> to vector<1x32xf32>
    %23 = vector.shape_cast %20 : vector<1x32xf32> to vector<1x1x32xf32>
    tpu.vector_store %arg5[%c0_22, %c0_23, %c0_24], %23 {strides = array<i32>} : memref<1x1x32xf32, #tpu.memory_space<vmem>>, vector<1x1x32xf32>,
    %24 = arith.mulf %14, %14 : vector<64x32xf32>
    %cst_25 = arith.constant dense<0.000000e+00> : vector<32xf32>
    %25 = vector.multi_reduction <add>, %24, %cst_25 [0] : vector<64x32xf32> to vector<32xf32>
    %26 = vector.shape_cast %25 : vector<32xf32> to vector<1x32xf32>
    %c0_26 = arith.constant 0 : index
    %c0_27 = arith.constant 0 : index
    %c0_28 = arith.constant 0 : index
    %27 = vector.load %arg6[%c0_26, %c0_27, %c0_28] : memref<1x1x32xf32, #tpu.memory_space<vmem>>, vector<1x1x32xf32>
    %28 = vector.shape_cast %27 : vector<1x1x32xf32> to vector<1x32xf32>
    %29 = vector.shape_cast %26 : vector<1x32xf32> to vector<1x1x32xf32>
    tpu.vector_store %arg6[%c0_26, %c0_27, %c0_28], %29 {strides = array<i32>} : memref<1x1x32xf32, #tpu.memory_space<vmem>>, vector<1x1x32xf32>,
    return
  }
  func.func @transform_0(%arg0: i32, %arg1: i32) -> (i32, i32, i32) {
    %c0_i32 = arith.constant 0 : i32
    %c0_i32_0 = arith.constant 0 : i32
    %c0_i32_1 = arith.constant 0 : i32
    return %arg0, %c0_i32, %c0_i32_0 : i32, i32, i32
  }
  func.func @transform_1(%arg0: i32, %arg1: i32) -> (i32, i32, i32) {
    %c0_i32 = arith.constant 0 : i32
    %c0_i32_0 = arith.constant 0 : i32
    %c0_i32_1 = arith.constant 0 : i32
    return %c0_i32, %c0_i32_0, %arg1 : i32, i32, i32
  }
  func.func @transform_2(%arg0: i32, %arg1: i32) -> (i32, i32, i32) {
    %c0_i32 = arith.constant 0 : i32
    %c0_i32_0 = arith.constant 0 : i32
    return %arg0, %c0_i32, %arg1 : i32, i32, i32
  }
  func.func @transform_3(%arg0: i32, %arg1: i32) -> (i32, i32, i32) {
    %c0_i32 = arith.constant 0 : i32
    %c0_i32_0 = arith.constant 0 : i32
    return %arg0, %c0_i32, %arg1 : i32, i32, i32
  }
  func.func @transform_4(%arg0: i32, %arg1: i32) -> (i32, i32, i32) {
    %c0_i32 = arith.constant 0 : i32
    %c0_i32_0 = arith.constant 0 : i32
    return %arg0, %c0_i32, %arg1 : i32, i32, i32
  }
}

module attributes {stable_mosaic.version = 11 : i64} {
  func.func @_bn_leaky_kernel(%arg0: i32, %arg1: i32, %arg2: memref<1x64x32xbf16, #tpu.memory_space<vmem>>, %arg3: memref<1x32xf32, #tpu.memory_space<vmem>>, %arg4: memref<1x32xf32, #tpu.memory_space<vmem>>, %arg5: memref<1x64x32xbf16, #tpu.memory_space<vmem>>) attributes {dimension_semantics = [#tpu.dimension_semantics<parallel>, #tpu.dimension_semantics<parallel>], iteration_bounds = array<i64: 2, 1>, scalar_prefetch = 0 : i64, scratch_operands = 0 : i64, tpu.core_type = #tpu.core_type<tc>, window_params = [{transform_indices = @transform_0, window_bounds = array<i64: 1, 64, 32>}, {transform_indices = @transform_1, window_bounds = array<i64: 1, 32>}, {transform_indices = @transform_2, window_bounds = array<i64: 1, 32>}, {transform_indices = @transform_3, window_bounds = array<i64: 1, 64, 32>}]} {
    %c0 = arith.constant 0 : index
    %c0_0 = arith.constant 0 : index
    %c0_1 = arith.constant 0 : index
    %0 = vector.load %arg2[%c0, %c0_0, %c0_1] : memref<1x64x32xbf16, #tpu.memory_space<vmem>>, vector<1x64x32xbf16>
    %1 = vector.shape_cast %0 : vector<1x64x32xbf16> to vector<64x32xbf16>
    %2 = arith.extf %1 : vector<64x32xbf16> to vector<64x32xf32>
    %c0_2 = arith.constant 0 : index
    %c0_3 = arith.constant 0 : index
    %3 = vector.load %arg3[%c0_2, %c0_3] : memref<1x32xf32, #tpu.memory_space<vmem>>, vector<1x32xf32>
    %4 = vector.broadcast %3 : vector<1x32xf32> to vector<64x32xf32>
    %5 = arith.mulf %2, %4 : vector<64x32xf32>
    %c0_4 = arith.constant 0 : index
    %c0_5 = arith.constant 0 : index
    %6 = vector.load %arg4[%c0_4, %c0_5] : memref<1x32xf32, #tpu.memory_space<vmem>>, vector<1x32xf32>
    %7 = vector.broadcast %6 : vector<1x32xf32> to vector<64x32xf32>
    %8 = arith.addf %5, %7 : vector<64x32xf32>
    %cst = arith.constant 0.000000e+00 : f32
    %9 = vector.broadcast %cst : f32 to vector<64x32xf32>
    %10 = arith.cmpf oge, %8, %9 : vector<64x32xf32>
    %cst_6 = arith.constant 2.000000e-01 : f32
    %11 = vector.broadcast %cst_6 : f32 to vector<64x32xf32>
    %12 = arith.mulf %11, %8 : vector<64x32xf32>
    %13 = arith.select %10, %8, %12 : vector<64x32xi1>, vector<64x32xf32>
    %14 = arith.truncf %13 : vector<64x32xf32> to vector<64x32xbf16>
    %c0_7 = arith.constant 0 : index
    %c0_8 = arith.constant 0 : index
    %c0_9 = arith.constant 0 : index
    %15 = vector.load %arg5[%c0_7, %c0_8, %c0_9] : memref<1x64x32xbf16, #tpu.memory_space<vmem>>, vector<1x64x32xbf16>
    %16 = vector.shape_cast %15 : vector<1x64x32xbf16> to vector<64x32xbf16>
    %17 = vector.shape_cast %14 : vector<64x32xbf16> to vector<1x64x32xbf16>
    tpu.vector_store %arg5[%c0_7, %c0_8, %c0_9], %17 {strides = array<i32>} : memref<1x64x32xbf16, #tpu.memory_space<vmem>>, vector<1x64x32xbf16>,
    return
  }
  func.func @transform_0(%arg0: i32, %arg1: i32) -> (i32, i32, i32) {
    %c0_i32 = arith.constant 0 : i32
    %c0_i32_0 = arith.constant 0 : i32
    return %arg0, %c0_i32, %arg1 : i32, i32, i32
  }
  func.func @transform_1(%arg0: i32, %arg1: i32) -> (i32, i32) {
    %c0_i32 = arith.constant 0 : i32
    %c0_i32_0 = arith.constant 0 : i32
    return %c0_i32, %arg1 : i32, i32
  }
  func.func @transform_2(%arg0: i32, %arg1: i32) -> (i32, i32) {
    %c0_i32 = arith.constant 0 : i32
    %c0_i32_0 = arith.constant 0 : i32
    return %c0_i32, %arg1 : i32, i32
  }
  func.func @transform_3(%arg0: i32, %arg1: i32) -> (i32, i32, i32) {
    %c0_i32 = arith.constant 0 : i32
    %c0_i32_0 = arith.constant 0 : i32
    return %arg0, %c0_i32, %arg1 : i32, i32, i32
  }
}

module attributes {stable_mosaic.version = 11 : i64} {
  func.func @_conv_stats_kernel(%arg0: i32, %arg1: i32, %arg2: memref<1x20x256xbf16, #tpu.memory_space<vmem>>, %arg3: memref<2x256x64xbf16, #tpu.memory_space<vmem>>, %arg4: memref<1x16x64xbf16, #tpu.memory_space<vmem>>, %arg5: memref<1x1x64xf32, #tpu.memory_space<vmem>>, %arg6: memref<1x1x64xf32, #tpu.memory_space<vmem>>, %arg7: memref<16x64xf32, #tpu.memory_space<vmem>>) attributes {dimension_semantics = [#tpu.dimension_semantics<parallel>, #tpu.dimension_semantics<parallel>], iteration_bounds = array<i64: 2, 1>, scalar_prefetch = 0 : i64, scratch_operands = 1 : i64, tpu.core_type = #tpu.core_type<tc>, window_params = [{transform_indices = @transform_0, window_bounds = array<i64: 1, 20, 256>}, {transform_indices = @transform_1, window_bounds = array<i64: 2, 256, 64>}, {transform_indices = @transform_2, window_bounds = array<i64: 1, 16, 64>}, {transform_indices = @transform_3, window_bounds = array<i64: 1, 1, 64>}, {transform_indices = @transform_4, window_bounds = array<i64: 1, 1, 64>}]} {
    %c0 = arith.constant 0 : index
    %c0_0 = arith.constant 0 : index
    %c0_1 = arith.constant 0 : index
    %0 = vector.load %arg2[%c0, %c0_0, %c0_1] : memref<1x20x256xbf16, #tpu.memory_space<vmem>>, vector<1x16x256xbf16>
    %1 = vector.shape_cast %0 : vector<1x16x256xbf16> to vector<16x256xbf16>
    %c0_2 = arith.constant 0 : index
    %c0_3 = arith.constant 0 : index
    %c0_4 = arith.constant 0 : index
    %2 = vector.load %arg3[%c0_2, %c0_3, %c0_4] : memref<2x256x64xbf16, #tpu.memory_space<vmem>>, vector<1x256x64xbf16>
    %3 = vector.shape_cast %2 : vector<1x256x64xbf16> to vector<256x64xbf16>
    %cst = arith.constant dense<0.000000e+00> : vector<16x64xf32>
    %4 = tpu.matmul %1, %3, %cst {dimension_numbers = #tpu.dot_dimension_numbers<[1], [0], [0], [1], [0, 0, 1, 1], [], []>} : vector<16x256xbf16>, vector<256x64xbf16>, vector<16x64xf32> -> vector<16x64xf32>
    %c0_5 = arith.constant 0 : index
    %c0_6 = arith.constant 0 : index
    %5 = vector.load %arg7[%c0_5, %c0_6] : memref<16x64xf32, #tpu.memory_space<vmem>>, vector<16x64xf32>
    tpu.vector_store %arg7[%c0_5, %c0_6], %4 {strides = array<i32>} : memref<16x64xf32, #tpu.memory_space<vmem>>, vector<16x64xf32>,
    %c0_7 = arith.constant 0 : index
    %c0_8 = arith.constant 0 : index
    %6 = vector.load %arg7[%c0_7, %c0_8] : memref<16x64xf32, #tpu.memory_space<vmem>>, vector<16x64xf32>
    %c0_9 = arith.constant 0 : index
    %c4 = arith.constant 4 : index
    %c0_10 = arith.constant 0 : index
    %7 = vector.load %arg2[%c0_9, %c4, %c0_10] : memref<1x20x256xbf16, #tpu.memory_space<vmem>>, vector<1x16x256xbf16>
    %8 = vector.shape_cast %7 : vector<1x16x256xbf16> to vector<16x256xbf16>
    %c1 = arith.constant 1 : index
    %c0_11 = arith.constant 0 : index
    %c0_12 = arith.constant 0 : index
    %9 = vector.load %arg3[%c1, %c0_11, %c0_12] : memref<2x256x64xbf16, #tpu.memory_space<vmem>>, vector<1x256x64xbf16>
    %10 = vector.shape_cast %9 : vector<1x256x64xbf16> to vector<256x64xbf16>
    %cst_13 = arith.constant dense<0.000000e+00> : vector<16x64xf32>
    %11 = tpu.matmul %8, %10, %cst_13 {dimension_numbers = #tpu.dot_dimension_numbers<[1], [0], [0], [1], [0, 0, 1, 1], [], []>} : vector<16x256xbf16>, vector<256x64xbf16>, vector<16x64xf32> -> vector<16x64xf32>
    %12 = arith.addf %6, %11 : vector<16x64xf32>
    %c0_14 = arith.constant 0 : index
    %c0_15 = arith.constant 0 : index
    %13 = vector.load %arg7[%c0_14, %c0_15] : memref<16x64xf32, #tpu.memory_space<vmem>>, vector<16x64xf32>
    tpu.vector_store %arg7[%c0_14, %c0_15], %12 {strides = array<i32>} : memref<16x64xf32, #tpu.memory_space<vmem>>, vector<16x64xf32>,
    %c0_16 = arith.constant 0 : index
    %c0_17 = arith.constant 0 : index
    %14 = vector.load %arg7[%c0_16, %c0_17] : memref<16x64xf32, #tpu.memory_space<vmem>>, vector<16x64xf32>
    %15 = arith.truncf %14 : vector<16x64xf32> to vector<16x64xbf16>
    %c0_18 = arith.constant 0 : index
    %c0_19 = arith.constant 0 : index
    %c0_20 = arith.constant 0 : index
    %16 = vector.load %arg4[%c0_18, %c0_19, %c0_20] : memref<1x16x64xbf16, #tpu.memory_space<vmem>>, vector<1x16x64xbf16>
    %17 = vector.shape_cast %16 : vector<1x16x64xbf16> to vector<16x64xbf16>
    %18 = vector.shape_cast %15 : vector<16x64xbf16> to vector<1x16x64xbf16>
    tpu.vector_store %arg4[%c0_18, %c0_19, %c0_20], %18 {strides = array<i32>} : memref<1x16x64xbf16, #tpu.memory_space<vmem>>, vector<1x16x64xbf16>,
    %cst_21 = arith.constant dense<0.000000e+00> : vector<64xf32>
    %19 = vector.multi_reduction <add>, %14, %cst_21 [0] : vector<16x64xf32> to vector<64xf32>
    %20 = vector.shape_cast %19 : vector<64xf32> to vector<1x64xf32>
    %c0_22 = arith.constant 0 : index
    %c0_23 = arith.constant 0 : index
    %c0_24 = arith.constant 0 : index
    %21 = vector.load %arg5[%c0_22, %c0_23, %c0_24] : memref<1x1x64xf32, #tpu.memory_space<vmem>>, vector<1x1x64xf32>
    %22 = vector.shape_cast %21 : vector<1x1x64xf32> to vector<1x64xf32>
    %23 = vector.shape_cast %20 : vector<1x64xf32> to vector<1x1x64xf32>
    tpu.vector_store %arg5[%c0_22, %c0_23, %c0_24], %23 {strides = array<i32>} : memref<1x1x64xf32, #tpu.memory_space<vmem>>, vector<1x1x64xf32>,
    %24 = arith.mulf %14, %14 : vector<16x64xf32>
    %cst_25 = arith.constant dense<0.000000e+00> : vector<64xf32>
    %25 = vector.multi_reduction <add>, %24, %cst_25 [0] : vector<16x64xf32> to vector<64xf32>
    %26 = vector.shape_cast %25 : vector<64xf32> to vector<1x64xf32>
    %c0_26 = arith.constant 0 : index
    %c0_27 = arith.constant 0 : index
    %c0_28 = arith.constant 0 : index
    %27 = vector.load %arg6[%c0_26, %c0_27, %c0_28] : memref<1x1x64xf32, #tpu.memory_space<vmem>>, vector<1x1x64xf32>
    %28 = vector.shape_cast %27 : vector<1x1x64xf32> to vector<1x64xf32>
    %29 = vector.shape_cast %26 : vector<1x64xf32> to vector<1x1x64xf32>
    tpu.vector_store %arg6[%c0_26, %c0_27, %c0_28], %29 {strides = array<i32>} : memref<1x1x64xf32, #tpu.memory_space<vmem>>, vector<1x1x64xf32>,
    return
  }
  func.func @transform_0(%arg0: i32, %arg1: i32) -> (i32, i32, i32) {
    %c0_i32 = arith.constant 0 : i32
    %c0_i32_0 = arith.constant 0 : i32
    %c0_i32_1 = arith.constant 0 : i32
    return %arg0, %c0_i32, %c0_i32_0 : i32, i32, i32
  }
  func.func @transform_1(%arg0: i32, %arg1: i32) -> (i32, i32, i32) {
    %c0_i32 = arith.constant 0 : i32
    %c0_i32_0 = arith.constant 0 : i32
    %c0_i32_1 = arith.constant 0 : i32
    return %c0_i32, %c0_i32_0, %arg1 : i32, i32, i32
  }
  func.func @transform_2(%arg0: i32, %arg1: i32) -> (i32, i32, i32) {
    %c0_i32 = arith.constant 0 : i32
    %c0_i32_0 = arith.constant 0 : i32
    return %arg0, %c0_i32, %arg1 : i32, i32, i32
  }
  func.func @transform_3(%arg0: i32, %arg1: i32) -> (i32, i32, i32) {
    %c0_i32 = arith.constant 0 : i32
    %c0_i32_0 = arith.constant 0 : i32
    return %arg0, %c0_i32, %arg1 : i32, i32, i32
  }
  func.func @transform_4(%arg0: i32, %arg1: i32) -> (i32, i32, i32) {
    %c0_i32 = arith.constant 0 : i32
    %c0_i32_0 = arith.constant 0 : i32
    return %arg0, %c0_i32, %arg1 : i32, i32, i32
  }
}

module attributes {stable_mosaic.version = 11 : i64} {
  func.func @_bn_leaky_kernel(%arg0: i32, %arg1: i32, %arg2: memref<1x16x64xbf16, #tpu.memory_space<vmem>>, %arg3: memref<1x64xf32, #tpu.memory_space<vmem>>, %arg4: memref<1x64xf32, #tpu.memory_space<vmem>>, %arg5: memref<1x16x64xbf16, #tpu.memory_space<vmem>>) attributes {dimension_semantics = [#tpu.dimension_semantics<parallel>, #tpu.dimension_semantics<parallel>], iteration_bounds = array<i64: 2, 1>, scalar_prefetch = 0 : i64, scratch_operands = 0 : i64, tpu.core_type = #tpu.core_type<tc>, window_params = [{transform_indices = @transform_0, window_bounds = array<i64: 1, 16, 64>}, {transform_indices = @transform_1, window_bounds = array<i64: 1, 64>}, {transform_indices = @transform_2, window_bounds = array<i64: 1, 64>}, {transform_indices = @transform_3, window_bounds = array<i64: 1, 16, 64>}]} {
    %c0 = arith.constant 0 : index
    %c0_0 = arith.constant 0 : index
    %c0_1 = arith.constant 0 : index
    %0 = vector.load %arg2[%c0, %c0_0, %c0_1] : memref<1x16x64xbf16, #tpu.memory_space<vmem>>, vector<1x16x64xbf16>
    %1 = vector.shape_cast %0 : vector<1x16x64xbf16> to vector<16x64xbf16>
    %2 = arith.extf %1 : vector<16x64xbf16> to vector<16x64xf32>
    %c0_2 = arith.constant 0 : index
    %c0_3 = arith.constant 0 : index
    %3 = vector.load %arg3[%c0_2, %c0_3] : memref<1x64xf32, #tpu.memory_space<vmem>>, vector<1x64xf32>
    %4 = vector.broadcast %3 : vector<1x64xf32> to vector<16x64xf32>
    %5 = arith.mulf %2, %4 : vector<16x64xf32>
    %c0_4 = arith.constant 0 : index
    %c0_5 = arith.constant 0 : index
    %6 = vector.load %arg4[%c0_4, %c0_5] : memref<1x64xf32, #tpu.memory_space<vmem>>, vector<1x64xf32>
    %7 = vector.broadcast %6 : vector<1x64xf32> to vector<16x64xf32>
    %8 = arith.addf %5, %7 : vector<16x64xf32>
    %cst = arith.constant 0.000000e+00 : f32
    %9 = vector.broadcast %cst : f32 to vector<16x64xf32>
    %10 = arith.cmpf oge, %8, %9 : vector<16x64xf32>
    %cst_6 = arith.constant 2.000000e-01 : f32
    %11 = vector.broadcast %cst_6 : f32 to vector<16x64xf32>
    %12 = arith.mulf %11, %8 : vector<16x64xf32>
    %13 = arith.select %10, %8, %12 : vector<16x64xi1>, vector<16x64xf32>
    %14 = arith.truncf %13 : vector<16x64xf32> to vector<16x64xbf16>
    %c0_7 = arith.constant 0 : index
    %c0_8 = arith.constant 0 : index
    %c0_9 = arith.constant 0 : index
    %15 = vector.load %arg5[%c0_7, %c0_8, %c0_9] : memref<1x16x64xbf16, #tpu.memory_space<vmem>>, vector<1x16x64xbf16>
    %16 = vector.shape_cast %15 : vector<1x16x64xbf16> to vector<16x64xbf16>
    %17 = vector.shape_cast %14 : vector<16x64xbf16> to vector<1x16x64xbf16>
    tpu.vector_store %arg5[%c0_7, %c0_8, %c0_9], %17 {strides = array<i32>} : memref<1x16x64xbf16, #tpu.memory_space<vmem>>, vector<1x16x64xbf16>,
    return
  }
  func.func @transform_0(%arg0: i32, %arg1: i32) -> (i32, i32, i32) {
    %c0_i32 = arith.constant 0 : i32
    %c0_i32_0 = arith.constant 0 : i32
    return %arg0, %c0_i32, %arg1 : i32, i32, i32
  }
  func.func @transform_1(%arg0: i32, %arg1: i32) -> (i32, i32) {
    %c0_i32 = arith.constant 0 : i32
    %c0_i32_0 = arith.constant 0 : i32
    return %c0_i32, %arg1 : i32, i32
  }
  func.func @transform_2(%arg0: i32, %arg1: i32) -> (i32, i32) {
    %c0_i32 = arith.constant 0 : i32
    %c0_i32_0 = arith.constant 0 : i32
    return %c0_i32, %arg1 : i32, i32
  }
  func.func @transform_3(%arg0: i32, %arg1: i32) -> (i32, i32, i32) {
    %c0_i32 = arith.constant 0 : i32
    %c0_i32_0 = arith.constant 0 : i32
    return %arg0, %c0_i32, %arg1 : i32, i32, i32
  }
}

module attributes {stable_mosaic.version = 11 : i64} {
  func.func @_conv_kernel(%arg0: i32, %arg1: i32, %arg2: memref<1x4x256xbf16, #tpu.memory_space<vmem>>, %arg3: memref<4x256x128xbf16, #tpu.memory_space<vmem>>, %arg4: memref<1x1x128xf32, #tpu.memory_space<vmem>>, %arg5: memref<1x128xf32, #tpu.memory_space<vmem>>) attributes {dimension_semantics = [#tpu.dimension_semantics<parallel>, #tpu.dimension_semantics<parallel>], iteration_bounds = array<i64: 2, 1>, scalar_prefetch = 0 : i64, scratch_operands = 1 : i64, tpu.core_type = #tpu.core_type<tc>, window_params = [{transform_indices = @transform_0, window_bounds = array<i64: 1, 4, 256>}, {transform_indices = @transform_1, window_bounds = array<i64: 4, 256, 128>}, {transform_indices = @transform_2, window_bounds = array<i64: 1, 1, 128>}]} {
    %c0 = arith.constant 0 : index
    %c0_0 = arith.constant 0 : index
    %c0_1 = arith.constant 0 : index
    %0 = vector.load %arg2[%c0, %c0_0, %c0_1] : memref<1x4x256xbf16, #tpu.memory_space<vmem>>, vector<1x1x256xbf16>
    %1 = vector.shape_cast %0 : vector<1x1x256xbf16> to vector<1x256xbf16>
    %c0_2 = arith.constant 0 : index
    %c0_3 = arith.constant 0 : index
    %c0_4 = arith.constant 0 : index
    %2 = vector.load %arg3[%c0_2, %c0_3, %c0_4] : memref<4x256x128xbf16, #tpu.memory_space<vmem>>, vector<1x256x128xbf16>
    %3 = vector.shape_cast %2 : vector<1x256x128xbf16> to vector<256x128xbf16>
    %cst = arith.constant dense<0.000000e+00> : vector<1x128xf32>
    %4 = tpu.matmul %1, %3, %cst {dimension_numbers = #tpu.dot_dimension_numbers<[1], [0], [0], [1], [0, 0, 1, 1], [], []>} : vector<1x256xbf16>, vector<256x128xbf16>, vector<1x128xf32> -> vector<1x128xf32>
    %c0_5 = arith.constant 0 : index
    %c0_6 = arith.constant 0 : index
    %5 = vector.load %arg5[%c0_5, %c0_6] : memref<1x128xf32, #tpu.memory_space<vmem>>, vector<1x128xf32>
    tpu.vector_store %arg5[%c0_5, %c0_6], %4 {strides = array<i32>} : memref<1x128xf32, #tpu.memory_space<vmem>>, vector<1x128xf32>,
    %c0_7 = arith.constant 0 : index
    %c0_8 = arith.constant 0 : index
    %6 = vector.load %arg5[%c0_7, %c0_8] : memref<1x128xf32, #tpu.memory_space<vmem>>, vector<1x128xf32>
    %c0_9 = arith.constant 0 : index
    %c1 = arith.constant 1 : index
    %c0_10 = arith.constant 0 : index
    %7 = vector.load %arg2[%c0_9, %c1, %c0_10] : memref<1x4x256xbf16, #tpu.memory_space<vmem>>, vector<1x1x256xbf16>
    %8 = vector.shape_cast %7 : vector<1x1x256xbf16> to vector<1x256xbf16>
    %c1_11 = arith.constant 1 : index
    %c0_12 = arith.constant 0 : index
    %c0_13 = arith.constant 0 : index
    %9 = vector.load %arg3[%c1_11, %c0_12, %c0_13] : memref<4x256x128xbf16, #tpu.memory_space<vmem>>, vector<1x256x128xbf16>
    %10 = vector.shape_cast %9 : vector<1x256x128xbf16> to vector<256x128xbf16>
    %cst_14 = arith.constant dense<0.000000e+00> : vector<1x128xf32>
    %11 = tpu.matmul %8, %10, %cst_14 {dimension_numbers = #tpu.dot_dimension_numbers<[1], [0], [0], [1], [0, 0, 1, 1], [], []>} : vector<1x256xbf16>, vector<256x128xbf16>, vector<1x128xf32> -> vector<1x128xf32>
    %12 = arith.addf %6, %11 : vector<1x128xf32>
    %c0_15 = arith.constant 0 : index
    %c0_16 = arith.constant 0 : index
    %13 = vector.load %arg5[%c0_15, %c0_16] : memref<1x128xf32, #tpu.memory_space<vmem>>, vector<1x128xf32>
    tpu.vector_store %arg5[%c0_15, %c0_16], %12 {strides = array<i32>} : memref<1x128xf32, #tpu.memory_space<vmem>>, vector<1x128xf32>,
    %c0_17 = arith.constant 0 : index
    %c0_18 = arith.constant 0 : index
    %14 = vector.load %arg5[%c0_17, %c0_18] : memref<1x128xf32, #tpu.memory_space<vmem>>, vector<1x128xf32>
    %c0_19 = arith.constant 0 : index
    %c2 = arith.constant 2 : index
    %c0_20 = arith.constant 0 : index
    %15 = vector.load %arg2[%c0_19, %c2, %c0_20] : memref<1x4x256xbf16, #tpu.memory_space<vmem>>, vector<1x1x256xbf16>
    %16 = vector.shape_cast %15 : vector<1x1x256xbf16> to vector<1x256xbf16>
    %c2_21 = arith.constant 2 : index
    %c0_22 = arith.constant 0 : index
    %c0_23 = arith.constant 0 : index
    %17 = vector.load %arg3[%c2_21, %c0_22, %c0_23] : memref<4x256x128xbf16, #tpu.memory_space<vmem>>, vector<1x256x128xbf16>
    %18 = vector.shape_cast %17 : vector<1x256x128xbf16> to vector<256x128xbf16>
    %cst_24 = arith.constant dense<0.000000e+00> : vector<1x128xf32>
    %19 = tpu.matmul %16, %18, %cst_24 {dimension_numbers = #tpu.dot_dimension_numbers<[1], [0], [0], [1], [0, 0, 1, 1], [], []>} : vector<1x256xbf16>, vector<256x128xbf16>, vector<1x128xf32> -> vector<1x128xf32>
    %20 = arith.addf %14, %19 : vector<1x128xf32>
    %c0_25 = arith.constant 0 : index
    %c0_26 = arith.constant 0 : index
    %21 = vector.load %arg5[%c0_25, %c0_26] : memref<1x128xf32, #tpu.memory_space<vmem>>, vector<1x128xf32>
    tpu.vector_store %arg5[%c0_25, %c0_26], %20 {strides = array<i32>} : memref<1x128xf32, #tpu.memory_space<vmem>>, vector<1x128xf32>,
    %c0_27 = arith.constant 0 : index
    %c0_28 = arith.constant 0 : index
    %22 = vector.load %arg5[%c0_27, %c0_28] : memref<1x128xf32, #tpu.memory_space<vmem>>, vector<1x128xf32>
    %c0_29 = arith.constant 0 : index
    %c3 = arith.constant 3 : index
    %c0_30 = arith.constant 0 : index
    %23 = vector.load %arg2[%c0_29, %c3, %c0_30] : memref<1x4x256xbf16, #tpu.memory_space<vmem>>, vector<1x1x256xbf16>
    %24 = vector.shape_cast %23 : vector<1x1x256xbf16> to vector<1x256xbf16>
    %c3_31 = arith.constant 3 : index
    %c0_32 = arith.constant 0 : index
    %c0_33 = arith.constant 0 : index
    %25 = vector.load %arg3[%c3_31, %c0_32, %c0_33] : memref<4x256x128xbf16, #tpu.memory_space<vmem>>, vector<1x256x128xbf16>
    %26 = vector.shape_cast %25 : vector<1x256x128xbf16> to vector<256x128xbf16>
    %cst_34 = arith.constant dense<0.000000e+00> : vector<1x128xf32>
    %27 = tpu.matmul %24, %26, %cst_34 {dimension_numbers = #tpu.dot_dimension_numbers<[1], [0], [0], [1], [0, 0, 1, 1], [], []>} : vector<1x256xbf16>, vector<256x128xbf16>, vector<1x128xf32> -> vector<1x128xf32>
    %28 = arith.addf %22, %27 : vector<1x128xf32>
    %c0_35 = arith.constant 0 : index
    %c0_36 = arith.constant 0 : index
    %29 = vector.load %arg5[%c0_35, %c0_36] : memref<1x128xf32, #tpu.memory_space<vmem>>, vector<1x128xf32>
    tpu.vector_store %arg5[%c0_35, %c0_36], %28 {strides = array<i32>} : memref<1x128xf32, #tpu.memory_space<vmem>>, vector<1x128xf32>,
    %c0_37 = arith.constant 0 : index
    %c0_38 = arith.constant 0 : index
    %30 = vector.load %arg5[%c0_37, %c0_38] : memref<1x128xf32, #tpu.memory_space<vmem>>, vector<1x128xf32>
    %c0_39 = arith.constant 0 : index
    %c0_40 = arith.constant 0 : index
    %c0_41 = arith.constant 0 : index
    %31 = vector.load %arg4[%c0_39, %c0_40, %c0_41] : memref<1x1x128xf32, #tpu.memory_space<vmem>>, vector<1x1x128xf32>
    %32 = vector.shape_cast %31 : vector<1x1x128xf32> to vector<1x128xf32>
    %33 = vector.shape_cast %30 : vector<1x128xf32> to vector<1x1x128xf32>
    tpu.vector_store %arg4[%c0_39, %c0_40, %c0_41], %33 {strides = array<i32>} : memref<1x1x128xf32, #tpu.memory_space<vmem>>, vector<1x1x128xf32>,
    return
  }
  func.func @transform_0(%arg0: i32, %arg1: i32) -> (i32, i32, i32) {
    %c0_i32 = arith.constant 0 : i32
    %c0_i32_0 = arith.constant 0 : i32
    %c0_i32_1 = arith.constant 0 : i32
    return %arg0, %c0_i32, %c0_i32_0 : i32, i32, i32
  }
  func.func @transform_1(%arg0: i32, %arg1: i32) -> (i32, i32, i32) {
    %c0_i32 = arith.constant 0 : i32
    %c0_i32_0 = arith.constant 0 : i32
    %c0_i32_1 = arith.constant 0 : i32
    return %c0_i32, %c0_i32_0, %arg1 : i32, i32, i32
  }
  func.func @transform_2(%arg0: i32, %arg1: i32) -> (i32, i32, i32) {
    %c0_i32 = arith.constant 0 : i32
    %c0_i32_0 = arith.constant 0 : i32
    return %arg0, %c0_i32, %arg1 : i32, i32, i32
  }
}

</mosaic_0001>

<bundles_post_ra>
// kernel: discriminator_forward.6
= control target key start
LH: loop header
LB: loop body
LE: loop exit
PB: predicated region body
PF: predicated region fallthrough
CT: control target
= control target key end

     0   :  { %s1725_s9 = smov 0   ;;  %s1727_s10 = smov 0   ;;  %s1972_s0 = inlined_call_operand.vmem [shape: bf16[2,272,24], index: 0, kind: input, shape index: {}]   ;;  %s1973_s1 = inlined_call_operand.vmem [shape: bf16[2,24,16], index: 1, kind: input, shape index: {}]   ;;  %s1974_s2 = inlined_call_operand.vmem [shape: bf16[2,256,16], index: 2, kind: output, shape index: {}]  }
   0x1   :  { %s1729_s11 = smov 0  }
   0x2 LB: > { %s24_s12 = sadd.s32 1, %s1704_s10  ;;  %p1373_p0 = scmp.ge.s32.totalorder %s1708_s11, 1  ;;  %s1708_s11 = sphi %s1729_s11, %s12_s11   ;;  %s1704_s10 = sphi %s1727_s10, %s1976_s10   ;;  %s1700_s9 = sphi %s1725_s9, %s1975_s9  }
   0x3   : > { %p26_p1 = scmp.ge.s32.totalorder %s24_s12, 2  ;;  %p135_p2 = scmp.lt.s32.totalorder %s1708_s11, 3 }
   0x5   : > { %s1978_s12 = smov (%p26_p1, %s24_s12), 0  ;;  %p136_p3 = pnand %p1373_p0, %p135_p2 }
   0x6   : > { %v1650_v0 = vld [vmem:[%s1973_s1] sm:$0xff] (!%p136_p3)   ;;  %vm355_vm0 = vcmask (!%p136_p3), 1043456   ;;  %v1651_v1 = vld [vmem:[%s1973_s1 + $0x8] ss:$0 sps:$4 sm:$0xff] (!%p136_p3)   ;;  %v1652_v2 = vld [vmem:[%s1973_s1 + $0xc] sm:$0xff] (!%p136_p3)   ;;  %p164_p4 = scmp.lt.s32.totalorder (!%p136_p3), %s1700_s9, 1 }
   0x7   : > { %139 = sbr.rel (%p136_p3) target bundleno = 320 (0x140), region = 28  ;;  %1551 = vmatprep.subr.bf16.mxu0 (!%p136_p3), %v1650_v0  ;;  %v1655_v3 = vld [vmem:[%s1973_s1 + $0x14] ss:$0 sps:$4 sm:$0xff] (!%p136_p3)   ;;  %v357_v4 = vsel (!%p136_p3), %vm355_vm0, %v1651_v1, 0  ;;  %1587 = vmatprep.subr.bf16.mxu1 (!%p136_p3), %v1652_v2  ;;  %vm306_vm1 = vcmask (!%p136_p3), 195584   ;;  %vm520_vm2 = vcmask (!%p136_p3), 130048  }
   0x8   : > { %1552 = vmatpush3.bf16.msra.mxu0 (!%p136_p3), %v1650_v0  ;;  %1588 = vmatpush3.bf16.msra.mxu1 (!%p136_p3), %v1652_v2  ;;  %v759_v5 = vsel (!%p136_p3), %vm355_vm0, %v1655_v3, 0  ;;  %vm1242_vm5 = vcmask (!%p136_p3), 125952  }
   0x9   : > { %1623 = vmatprep.subr.msk.bf16.mxu0 (!%p136_p3), %vm355_vm0, %v1651_v1  ;;  %1624 = vmatprep.subr.msk.bf16.mxu1 (!%p136_p3), %vm355_vm0, %v1655_v3 }
   0xc   : > { %1554 = vmatpush3.bf16.msra.mxu0 (!%p136_p3), %v357_v4  ;;  %1590 = vmatpush3.bf16.msra.mxu1 (!%p136_p3), %v759_v5 }
   0xe   : > { %s1980_s9 = smov (!%p164_p4, %s1700_s9), 1 }
   0xf   : > { %s1625_s21 = smul.u32 136, %s1980_s9  ;;  %s1482_s25 = sshll.u32 %s1980_s9, 7 }
  0x10   : > { %s1849_s28 = scalar_lea.vmem %s1974_s2, %s1482_s25 }
  0x11   : > { %s1761_s24 = scalar_lea.vmem %s1972_s0, %s1625_s21 }
  0x12   : > { %v1653_v6 = vld [vmem:[%s1761_s24] sm:$0xff]   ;;  %v1654_v7 = vld [vmem:[%s1761_s24 + $0x8] sm:$0xff]   ;;  %v1657_v9 = vld [vmem:[%s1761_s24 + $0x10] sm:$0xff]  }
  0x13   : > { %1555 = vmatprep.mubr.msk.bf16.mxu0 %vm306_vm1, %v1653_v6  ;;  %v1656_v8 = vld [vmem:[%s1761_s24 + $0x8] sm:$0xff]   ;;  %v1658_v10 = vld [vmem:[%s1761_s24 + $0x10] sm:$0xff]   ;;  %v1660_v11 = vld [vmem:[%s1761_s24 + $0x18] sm:$0xff]  }
  0x14   : > { %1556 = vmatmul.mubr.msk.bf16.vlgmr.msra.gmra.mrb[0].mxu0 %vm306_vm1, %v1654_v7  ;;  %1591 = vmatprep.mubr.msk.bf16.mxu1 %vm306_vm1, %v1656_v8  ;;  %v1659_v12 = vld [vmem:[%s1761_s24 + $0x18] sm:$0xff]   ;;  %v1662_v13 = vld [vmem:[%s1761_s24 + $0x20] sm:$0xff]   ;;  %v1664_v15 = vld [vmem:[%s1761_s24 + $0x28] sm:$0xff]  }
  0x15   : > { %1592 = vmatmul.mubr.msk.bf16.vlgmr.msra.gmra.mrb[0].mxu1 %vm306_vm1, %v1657_v9  ;;  %1559 = vmatprep.mubr.msk.bf16.mxu0 %vm306_vm1, %v1658_v10  ;;  %v1661_v14 = vld [vmem:[%s1761_s24 + $0x20] sm:$0xff]   ;;  %v1663_v16 = vld [vmem:[%s1761_s24 + $0x28] sm:$0xff]   ;;  %v1666_v17 = vld [vmem:[%s1761_s24 + $0x30] sm:$0xff]  }
  0x16   : > { %1595 = vmatprep.mubr.msk.bf16.mxu1 %vm306_vm1, %v1660_v11  ;;  %v1665_v18 = vld [vmem:[%s1761_s24 + $0x30] sm:$0xff]   ;;  %v1668_v19 = vld [vmem:[%s1761_s24 + $0x38] sm:$0xff]   ;;  %v1670_v21 = vld [vmem:[%s1761_s24 + $0x40] sm:$0xff]  }
  0x17   : > { %v1667_v20 = vld [vmem:[%s1761_s24 + $0x38] sm:$0xff]   ;;  %v1669_v22 = vld [vmem:[%s1761_s24 + $0x40] sm:$0xff]   ;;  %v1672_v23 = vld [vmem:[%s1761_s24 + $0x48] sm:$0xff]  }
  0x18   : > { %v1671_v24 = vld [vmem:[%s1761_s24 + $0x48] sm:$0xff]   ;;  %v1674_v25 = vld [vmem:[%s1761_s24 + $0x50] sm:$0xff]   ;;  %v1676_v27 = vld [vmem:[%s1761_s24 + $0x58] sm:$0xff]  }
  0x19   : > { %v1673_v26 = vld [vmem:[%s1761_s24 + $0x50] sm:$0xff]   ;;  %v1675_v28 = vld [vmem:[%s1761_s24 + $0x58] sm:$0xff]   ;;  %v1678_v29 = vld [vmem:[%s1761_s24 + $0x60] sm:$0xff]  }
  0x1a   : > { %v1677_v30 = vld [vmem:[%s1761_s24 + $0x60] sm:$0xff]   ;;  %v1680_v31 = vld [vmem:[%s1761_s24 + $0x68] sm:$0xff]   ;;  %v1682_v33 = vld [vmem:[%s1761_s24 + $0x70] sm:$0xff]  }
  0x1b   : > { %v1679_v32 = vld [vmem:[%s1761_s24 + $0x68] sm:$0xff]   ;;  %v1681_v34 = vld [vmem:[%s1761_s24 + $0x70] sm:$0xff]   ;;  %v1684_v35 = vld [vmem:[%s1761_s24 + $0x78] sm:$0xff]  }
  0x1c   : > { %1560 = vmatmul.mubr.msk.bf16.gmra.mrb[4].mxu0 %vm306_vm1, %v1659_v12  ;;  %v1683_v36 = vld [vmem:[%s1761_s24 + $0x78] sm:$0xff]   ;;  %v1685_v37 = vld [vmem:[%s1761_s24 + $0x80] sm:$0xff]  }
  0x1d   : > { %1563 = vmatprep.mubr.msk.bf16.mxu0 %vm306_vm1, %v1662_v13  ;;  %1596 = vmatmul.mubr.msk.bf16.gmra.mrb[4].mxu1 %vm306_vm1, %v1661_v14 }
  0x1e   : > { %1599 = vmatprep.mubr.msk.bf16.mxu1 %vm306_vm1, %v1664_v15 }
  0x24   : > { %1564 = vmatmul.mubr.msk.bf16.gmra.mrb[8].mxu0 %vm306_vm1, %v1663_v16 }
  0x25   : > { %1567 = vmatprep.mubr.msk.bf16.mxu0 %vm306_vm1, %v1666_v17  ;;  %1600 = vmatmul.mubr.msk.bf16.gmra.mrb[8].mxu1 %vm306_vm1, %v1665_v18 }
  0x26   : > { %1603 = vmatprep.mubr.msk.bf16.mxu1 %vm306_vm1, %v1668_v19 }
  0x2c   : > { %1568 = vmatmul.mubr.msk.bf16.gmra.mrb[12].mxu0 %vm306_vm1, %v1667_v20 }
  0x2d   : > { %1571 = vmatprep.mubr.msk.bf16.mxu0 %vm306_vm1, %v1670_v21  ;;  %1604 = vmatmul.mubr.msk.bf16.gmra.mrb[12].mxu1 %vm306_vm1, %v1669_v22 }
  0x2e   : > { %1607 = vmatprep.mubr.msk.bf16.mxu1 %vm306_vm1, %v1672_v23 }
  0x34   : > { %1572 = vmatmul.mubr.msk.bf16.gmra.mrb[16].mxu0 %vm306_vm1, %v1671_v24 }
  0x35   : > { %1575 = vmatprep.mubr.msk.bf16.mxu0 %vm306_vm1, %v1674_v25  ;;  %1608 = vmatmul.mubr.msk.bf16.gmra.mrb[16].mxu1 %vm306_vm1, %v1673_v26 }
  0x36   : > { %1611 = vmatprep.mubr.msk.bf16.mxu1 %vm306_vm1, %v1676_v27 }
  0x3c   : > { %1576 = vmatmul.mubr.msk.bf16.gmra.mrb[20].mxu0 %vm306_vm1, %v1675_v28 }
  0x3d   : > { %1579 = vmatprep.mubr.msk.bf16.mxu0 %vm306_vm1, %v1678_v29  ;;  %1612 = vmatmul.mubr.msk.bf16.gmra.mrb[20].mxu1 %vm306_vm1, %v1677_v30 }
  0x3e   : > { %1615 = vmatprep.mubr.msk.bf16.mxu1 %vm306_vm1, %v1680_v31 }
  0x44   : > { %1580 = vmatmul.mubr.msk.bf16.gmra.mrb[24].mxu0 %vm306_vm1, %v1679_v32 }
  0x45   : > { %1583 = vmatprep.mubr.msk.bf16.mxu0 %vm306_vm1, %v1682_v33  ;;  %1616 = vmatmul.mubr.msk.bf16.gmra.mrb[24].mxu1 %vm306_vm1, %v1681_v34 }
  0x46   : > { %1619 = vmatprep.mubr.msk.bf16.mxu1 %vm306_vm1, %v1684_v35 }
  0x4c   : > { %1584 = vmatmul.mubr.msk.bf16.gmra.mrb[28].mxu0 %vm306_vm1, %v1683_v36 }
  0x4d   : > { %1620 = vmatmul.mubr.msk.bf16.gmra.mrb[28].mxu1 %vm306_vm1, %v1685_v37 }
  0xe7   : > { %v1557_v38 = vpop.f32.mrb[0].mxu0 }
  0xe8   : > { %523 = vst.msk [vmem:[#allocation2 + $0x10] sm:$0xff] %vm520_vm2, %v1557_v38  ;;  %v393_v39 = vpop.f32.mrb[1].mxu0  ;;  %v1593_v41 = vpop.f32.mrb[0].mxu1 }
  0xe9   : > { %521 = vst.msk [vmem:[#allocation2] sm:$0xff] %vm520_vm2, %v393_v39  ;;  %v1558_v40 = vpop.f32.mrb[2].mxu0  ;;  %v795_v43 = vpop.f32.mrb[1].mxu1 }
  0xea   : > { %524 = vst.msk [vmem:[#allocation2 + $0x18] sm:$0xff] %vm520_vm2, %v1558_v40  ;;  %v396_v42 = vpop.f32.mrb[3].mxu0  ;;  %v1594_v44 = vpop.f32.mrb[2].mxu1 }
  0xeb   : > { %522 = vst.msk [vmem:[#allocation2 + $0x8] sm:$0xff] %vm520_vm2, %v396_v42  ;;  %v798_v45 = vpop.f32.mrb[3].mxu1 }
  0xef   : > { %v555_v46 = vld [vmem:[#allocation2 + $0x10] sm:$0xff]  ;;  %v1561_v47 = vpop.f32.mrb[4].mxu0 }
  0xf0   : > { %v924_v48 = vadd.f32 %v1593_v41, %v555_v46  ;;  %v553_v49 = vld [vmem:[#allocation2] sm:$0xff]  ;;  %527 = vst.msk [vmem:[#allocation2 + $0x30] sm:$0xff] %vm520_vm2, %v1561_v47  ;;  %v409_v50 = vpop.f32.mrb[5].mxu0  ;;  %v1597_v54 = vpop.f32.mrb[4].mxu1 }
  0xf1   : > { %v922_v51 = vadd.f32 %v795_v43, %v553_v49  ;;  %v556_v52 = vld [vmem:[#allocation2 + $0x18] sm:$0xff]  ;;  %525 = vst.msk [vmem:[#allocation2 + $0x20] sm:$0xff] %vm520_vm2, %v409_v50  ;;  %v1562_v53 = vpop.f32.mrb[6].mxu0  ;;  %v811_v58 = vpop.f32.mrb[5].mxu1 }
  0xf2   : > { %956 = vst.msk [vmem:[#allocation2 + $0x10] sm:$0xff] %vm520_vm2, %v924_v48  ;;  %v925_v55 = vadd.f32 %v1594_v44, %v556_v52  ;;  %v554_v56 = vld [vmem:[#allocation2 + $0x8] sm:$0xff]  ;;  %528 = vst.msk [vmem:[#allocation2 + $0x38] sm:$0xff] %vm520_vm2, %v1562_v53  ;;  %v412_v57 = vpop.f32.mrb[7].mxu0  ;;  %v1598_v60 = vpop.f32.mrb[6].mxu1 }
  0xf3   : > { %954 = vst.msk [vmem:[#allocation2] sm:$0xff] %vm520_vm2, %v922_v51  ;;  %v923_v59 = vadd.f32 %v798_v45, %v554_v56  ;;  %526 = vst.msk [vmem:[#allocation2 + $0x28] sm:$0xff] %vm520_vm2, %v412_v57  ;;  %v814_v61 = vpop.f32.mrb[7].mxu1 }
  0xf4   : > { %957 = vst.msk [vmem:[#allocation2 + $0x18] sm:$0xff] %vm520_vm2, %v925_v55 }
  0xf5   : > { %955 = vst.msk [vmem:[#allocation2 + $0x8] sm:$0xff] %vm520_vm2, %v923_v59 }
  0xf7   : > { %v559_v62 = vld [vmem:[#allocation2 + $0x30] sm:$0xff]  ;;  %v1565_v63 = vpop.f32.mrb[8].mxu0 }
  0xf8   : > { %v928_v0 = vadd.f32 %v1597_v54, %v559_v62  ;;  %v557_v1 = vld [vmem:[#allocation2 + $0x20] sm:$0xff]  ;;  %531 = vst.msk [vmem:[#allocation2 + $0x50] sm:$0xff] %vm520_vm2, %v1565_v63  ;;  %v425_v2 = vpop.f32.mrb[9].mxu0  ;;  %v1601_v7 = vpop.f32.mrb[8].mxu1 }
  0xf9   : > { %v988_v3 = vld [vmem:[#allocation2 + $0x10] sm:$0xff]  ;;  %v926_v4 = vadd.f32 %v811_v58, %v557_v1  ;;  %v560_v5 = vld [vmem:[#allocation2 + $0x38] sm:$0xff]  ;;  %529 = vst.msk [vmem:[#allocation2 + $0x40] sm:$0xff] %vm520_vm2, %v425_v2  ;;  %v1566_v6 = vpop.f32.mrb[10].mxu0  ;;  %v827_v16 = vpop.f32.mrb[9].mxu1 }
  0xfa   : > { %vm1020_vm3 = vcmp.ge.f32.partialorder %v988_v3, 0.0  ;;  %v1052_v8 = vmul.f32 0.2, %v988_v3  ;;  %v986_v9 = vld [vmem:[#allocation2] sm:$0xff]  ;;  %960 = vst.msk [vmem:[#allocation2 + $0x30] sm:$0xff] %vm520_vm2, %v928_v0  ;;  %v929_v10 = vadd.f32 %v1598_v60, %v560_v5  ;;  %v558_v11 = vld [vmem:[#allocation2 + $0x28] sm:$0xff] }
  0xfb   : > { %532 = vst.msk [vmem:[#allocation2 + $0x58] sm:$0xff] %vm520_vm2, %v1566_v6  ;;  %v428_v12 = vpop.f32.mrb[11].mxu0  ;;  %vm1018_vm4 = vcmp.ge.f32.partialorder %v986_v9, 0.0  ;;  %v1050_v13 = vmul.f32 0.2, %v986_v9  ;;  %v989_v14 = vld [vmem:[#allocation2 + $0x18] sm:$0xff]  ;;  %v927_v15 = vadd.f32 %v814_v61, %v558_v11 }
  0xfc   : > { %958 = vst.msk [vmem:[#allocation2 + $0x20] sm:$0xff] %vm520_vm2, %v926_v4  ;;  %530 = vst.msk [vmem:[#allocation2 + $0x48] sm:$0xff] %vm520_vm2, %v428_v12  ;;  %v1084_v17 = vsel %vm1020_vm3, %v988_v3, %v1052_v8  ;;  %vm1021_vm6 = vcmp.ge.f32.partialorder %v989_v14, 0.0  ;;  %v1053_v18 = vmul.f32 0.2, %v989_v14  ;;  %v987_v19 = vld [vmem:[#allocation2 + $0x8] sm:$0xff] }
  0xfd   : > { %961 = vst.msk [vmem:[#allocation2 + $0x38] sm:$0xff] %vm520_vm2, %v929_v10  ;;  %v1602_v20 = vpop.f32.mrb[10].mxu1  ;;  %v1485_v21 = vpack.c.bf16 %v1084_v17, %v1084_v17  ;;  %v1082_v22 = vsel %vm1018_vm4, %v986_v9, %v1050_v13  ;;  %vm1019_vm7 = vcmp.ge.f32.partialorder %v987_v19, 0.0  ;;  %v1051_v23 = vmul.f32 0.2, %v987_v19  ;;  %959 = vst.msk [vmem:[#allocation2 + $0x28] sm:$0xff] %vm520_vm2, %v927_v15 }
  0xfe   : > { %v830_v24 = vpop.f32.mrb[11].mxu1  ;;  %v1483_v25 = vpack.c.bf16 %v1082_v22, %v1082_v22  ;;  %v1085_v26 = vsel %vm1021_vm6, %v989_v14, %v1053_v18 }
  0xff   : > { %1245 = vst.msk [vmem:[%s1849_s28 + $0x8] sm:$0xf] %vm1242_vm5, %v1485_v21  ;;  %v1486_v27 = vpack.c.bf16 %v1085_v26, %v1085_v26  ;;  %v1083_v28 = vsel %vm1019_vm7, %v987_v19, %v1051_v23  ;;  %v563_v29 = vld [vmem:[#allocation2 + $0x50] sm:$0xff]  ;;  %v1569_v30 = vpop.f32.mrb[12].mxu0 }
 0x100   : > { %1243 = vst.msk [vmem:[%s1849_s28] sm:$0xf] %vm1242_vm5, %v1483_v25  ;;  %v1484_v31 = vpack.c.bf16 %v1083_v28, %v1083_v28  ;;  %v932_v32 = vadd.f32 %v1601_v7, %v563_v29  ;;  %v561_v33 = vld [vmem:[#allocation2 + $0x40] sm:$0xff]  ;;  %v441_v34 = vpop.f32.mrb[13].mxu0  ;;  %v1605_v39 = vpop.f32.mrb[12].mxu1 }
 0x101   : > { %535 = vst.msk [vmem:[#allocation2 + $0x70] sm:$0xff] %vm520_vm2, %v1569_v30  ;;  %v992_v35 = vld [vmem:[#allocation2 + $0x30] sm:$0xff]  ;;  %v930_v36 = vadd.f32 %v827_v16, %v561_v33  ;;  %533 = vst.msk [vmem:[#allocation2 + $0x60] sm:$0xff] %vm520_vm2, %v441_v34  ;;  %v1570_v38 = vpop.f32.mrb[14].mxu0  ;;  %v843_v48 = vpop.f32.mrb[13].mxu1 }
 0x102   : > { %1246 = vst.msk [vmem:[%s1849_s28 + $0xc] sm:$0xf] %vm1242_vm5, %v1486_v27  ;;  %v564_v37 = vld [vmem:[#allocation2 + $0x58] sm:$0xff]  ;;  %1244 = vst.msk [vmem:[%s1849_s28 + $0x4] sm:$0xf] %vm1242_vm5, %v1484_v31  ;;  %vm1024_vm8 = vcmp.ge.f32.partialorder %v992_v35, 0.0 }
 0x103   : > { %v1056_v40 = vmul.f32 0.2, %v992_v35  ;;  %v990_v41 = vld [vmem:[#allocation2 + $0x20] sm:$0xff]  ;;  %964 = vst.msk [vmem:[#allocation2 + $0x50] sm:$0xff] %vm520_vm2, %v932_v32  ;;  %v933_v42 = vadd.f32 %v1602_v20, %v564_v37  ;;  %v562_v43 = vld [vmem:[#allocation2 + $0x48] sm:$0xff]  ;;  %536 = vst.msk [vmem:[#allocation2 + $0x78] sm:$0xff] %vm520_vm2, %v1570_v38 }
 0x104   : > { %v444_v44 = vpop.f32.mrb[15].mxu0  ;;  %vm1022_vm9 = vcmp.ge.f32.partialorder %v990_v41, 0.0  ;;  %v1054_v45 = vmul.f32 0.2, %v990_v41  ;;  %v993_v46 = vld [vmem:[#allocation2 + $0x38] sm:$0xff]  ;;  %962 = vst.msk [vmem:[#allocation2 + $0x40] sm:$0xff] %vm520_vm2, %v930_v36  ;;  %v931_v47 = vadd.f32 %v830_v24, %v562_v43 }
 0x105   : > { %534 = vst.msk [vmem:[#allocation2 + $0x68] sm:$0xff] %vm520_vm2, %v444_v44  ;;  %v1088_v49 = vsel %vm1024_vm8, %v992_v35, %v1056_v40  ;;  %vm1025_vm10 = vcmp.ge.f32.partialorder %v993_v46, 0.0  ;;  %v1057_v50 = vmul.f32 0.2, %v993_v46  ;;  %v991_v51 = vld [vmem:[#allocation2 + $0x28] sm:$0xff]  ;;  %965 = vst.msk [vmem:[#allocation2 + $0x58] sm:$0xff] %vm520_vm2, %v933_v42 }
 0x106   : > { %v1606_v52 = vpop.f32.mrb[14].mxu1  ;;  %v1489_v53 = vpack.c.bf16 %v1088_v49, %v1088_v49  ;;  %v1086_v54 = vsel %vm1022_vm9, %v990_v41, %v1054_v45  ;;  %vm1023_vm11 = vcmp.ge.f32.partialorder %v991_v51, 0.0  ;;  %v1055_v55 = vmul.f32 0.2, %v991_v51  ;;  %963 = vst.msk [vmem:[#allocation2 + $0x48] sm:$0xff] %vm520_vm2, %v931_v47 }
 0x107   : > { %v846_v56 = vpop.f32.mrb[15].mxu1  ;;  %v1487_v57 = vpack.c.bf16 %v1086_v54, %v1086_v54  ;;  %v1089_v58 = vsel %vm1025_vm10, %v993_v46, %v1057_v50  ;;  %v1573_v62 = vpop.f32.mrb[16].mxu0 }
 0x108   : > { %1249 = vst.msk [vmem:[%s1849_s28 + $0x18] sm:$0xf] %vm1242_vm5, %v1489_v53  ;;  %v1490_v59 = vpack.c.bf16 %v1089_v58, %v1089_v58  ;;  %v1087_v60 = vsel %vm1023_vm11, %v991_v51, %v1055_v55  ;;  %v567_v61 = vld [vmem:[#allocation2 + $0x70] sm:$0xff]  ;;  %v565_v1 = vld [vmem:[#allocation2 + $0x60] sm:$0xff]  ;;  %v457_v2 = vpop.f32.mrb[17].mxu0  ;;  %v1609_v7 = vpop.f32.mrb[16].mxu1 }
 0x109   : > { %1247 = vst.msk [vmem:[%s1849_s28 + $0x10] sm:$0xf] %vm1242_vm5, %v1487_v57  ;;  %v1488_v63 = vpack.c.bf16 %v1087_v60, %v1087_v60  ;;  %v936_v0 = vadd.f32 %v1605_v39, %v567_v61  ;;  %v934_v4 = vadd.f32 %v843_v48, %v565_v1  ;;  %v1574_v6 = vpop.f32.mrb[18].mxu0  ;;  %v859_v16 = vpop.f32.mrb[17].mxu1 }
 0x10a   : > { %539 = vst.msk [vmem:[#allocation2 + $0x90] sm:$0xff] %vm520_vm2, %v1573_v62  ;;  %v996_v3 = vld [vmem:[#allocation2 + $0x50] sm:$0xff]  ;;  %v568_v5 = vld [vmem:[#allocation2 + $0x78] sm:$0xff]  ;;  %537 = vst.msk [vmem:[#allocation2 + $0x80] sm:$0xff] %vm520_vm2, %v457_v2  ;;  %v460_v12 = vpop.f32.mrb[19].mxu0  ;;  %v1610_v20 = vpop.f32.mrb[18].mxu1 }
 0x10b   : > { %1250 = vst.msk [vmem:[%s1849_s28 + $0x1c] sm:$0xf] %vm1242_vm5, %v1490_v59  ;;  %1248 = vst.msk [vmem:[%s1849_s28 + $0x14] sm:$0xf] %vm1242_vm5, %v1488_v63  ;;  %vm1028_vm12 = vcmp.ge.f32.partialorder %v996_v3, 0.0  ;;  %v994_v9 = vld [vmem:[#allocation2 + $0x40] sm:$0xff]  ;;  %v937_v10 = vadd.f32 %v1606_v52, %v568_v5 }
 0x10c   : > { %v1060_v8 = vmul.f32 0.2, %v996_v3  ;;  %968 = vst.msk [vmem:[#allocation2 + $0x70] sm:$0xff] %vm520_vm2, %v936_v0  ;;  %v566_v11 = vld [vmem:[#allocation2 + $0x68] sm:$0xff]  ;;  %540 = vst.msk [vmem:[#allocation2 + $0x98] sm:$0xff] %vm520_vm2, %v1574_v6  ;;  %vm1026_vm13 = vcmp.ge.f32.partialorder %v994_v9, 0.0 }
 0x10d   : > { %v1058_v13 = vmul.f32 0.2, %v994_v9  ;;  %v997_v14 = vld [vmem:[#allocation2 + $0x58] sm:$0xff]  ;;  %966 = vst.msk [vmem:[#allocation2 + $0x60] sm:$0xff] %vm520_vm2, %v934_v4  ;;  %v935_v15 = vadd.f32 %v846_v56, %v566_v11  ;;  %538 = vst.msk [vmem:[#allocation2 + $0x88] sm:$0xff] %vm520_vm2, %v460_v12  ;;  %v995_v19 = vld [vmem:[#allocation2 + $0x48] sm:$0xff] }
 0x10e   : > { %v1092_v17 = vsel %vm1028_vm12, %v996_v3, %v1060_v8  ;;  %vm1029_vm14 = vcmp.ge.f32.partialorder %v997_v14, 0.0  ;;  %v1061_v18 = vmul.f32 0.2, %v997_v14  ;;  %969 = vst.msk [vmem:[#allocation2 + $0x78] sm:$0xff] %vm520_vm2, %v937_v10  ;;  %vm1027_vm15 = vcmp.ge.f32.partialorder %v995_v19, 0.0  ;;  %v862_v24 = vpop.f32.mrb[19].mxu1 }
 0x10f   : > { %v1493_v21 = vpack.c.bf16 %v1092_v17, %v1092_v17  ;;  %v1090_v22 = vsel %vm1026_vm13, %v994_v9, %v1058_v13  ;;  %v1059_v23 = vmul.f32 0.2, %v995_v19  ;;  %967 = vst.msk [vmem:[#allocation2 + $0x68] sm:$0xff] %vm520_vm2, %v935_v15  ;;  %v1577_v30 = vpop.f32.mrb[20].mxu0 }
 0x110   : > { %v1491_v25 = vpack.c.bf16 %v1090_v22, %v1090_v22  ;;  %v1093_v26 = vsel %vm1029_vm14, %v997_v14, %v1061_v18  ;;  %543 = vst.msk [vmem:[#allocation2 + $0xb0] sm:$0xff] %vm520_vm2, %v1577_v30  ;;  %v473_v34 = vpop.f32.mrb[21].mxu0  ;;  %v1613_v39 = vpop.f32.mrb[20].mxu1 }
 0x111   : > { %1253 = vst.msk [vmem:[%s1849_s28 + $0x28] sm:$0xf] %vm1242_vm5, %v1493_v21  ;;  %v1494_v27 = vpack.c.bf16 %v1093_v26, %v1093_v26  ;;  %v1091_v28 = vsel %vm1027_vm15, %v995_v19, %v1059_v23  ;;  %v571_v29 = vld [vmem:[#allocation2 + $0x90] sm:$0xff]  ;;  %v569_v33 = vld [vmem:[#allocation2 + $0x80] sm:$0xff]  ;;  %v1578_v38 = vpop.f32.mrb[22].mxu0  ;;  %v875_v48 = vpop.f32.mrb[21].mxu1 }
 0x112   : > { %1251 = vst.msk [vmem:[%s1849_s28 + $0x20] sm:$0xf] %vm1242_vm5, %v1491_v25  ;;  %v1492_v31 = vpack.c.bf16 %v1091_v28, %v1091_v28  ;;  %v940_v32 = vadd.f32 %v1609_v7, %v571_v29  ;;  %v938_v36 = vadd.f32 %v859_v16, %v569_v33  ;;  %v476_v44 = vpop.f32.mrb[23].mxu0  ;;  %v1614_v52 = vpop.f32.mrb[22].mxu1 }
 0x113   : > { %1254 = vst.msk [vmem:[%s1849_s28 + $0x2c] sm:$0xf] %vm1242_vm5, %v1494_v27  ;;  %v1000_v35 = vld [vmem:[#allocation2 + $0x70] sm:$0xff]  ;;  %v572_v37 = vld [vmem:[#allocation2 + $0x98] sm:$0xff]  ;;  %v878_v56 = vpop.f32.mrb[23].mxu1 }
 0x114   : > { %541 = vst.msk [vmem:[#allocation2 + $0xa0] sm:$0xff] %vm520_vm2, %v473_v34  ;;  %vm1032_vm0 = vcmp.ge.f32.partialorder %v1000_v35, 0.0  ;;  %v1064_v40 = vmul.f32 0.2, %v1000_v35  ;;  %v998_v41 = vld [vmem:[#allocation2 + $0x60] sm:$0xff]  ;;  %972 = vst.msk [vmem:[#allocation2 + $0x90] sm:$0xff] %vm520_vm2, %v940_v32  ;;  %v941_v42 = vadd.f32 %v1610_v20, %v572_v37 }
 0x115   : > { %1252 = vst.msk [vmem:[%s1849_s28 + $0x24] sm:$0xf] %vm1242_vm5, %v1492_v31  ;;  %v570_v43 = vld [vmem:[#allocation2 + $0x88] sm:$0xff]  ;;  %vm1030_vm1 = vcmp.ge.f32.partialorder %v998_v41, 0.0  ;;  %v1062_v45 = vmul.f32 0.2, %v998_v41 }
 0x116   : > { %544 = vst.msk [vmem:[#allocation2 + $0xb8] sm:$0xff] %vm520_vm2, %v1578_v38  ;;  %v1001_v46 = vld [vmem:[#allocation2 + $0x78] sm:$0xff]  ;;  %970 = vst.msk [vmem:[#allocation2 + $0x80] sm:$0xff] %vm520_vm2, %v938_v36  ;;  %v939_v47 = vadd.f32 %v862_v24, %v570_v43  ;;  %v1096_v49 = vsel %vm1032_vm0, %v1000_v35, %v1064_v40  ;;  %v999_v51 = vld [vmem:[#allocation2 + $0x68] sm:$0xff] }
 0x117   : > { %542 = vst.msk [vmem:[#allocation2 + $0xa8] sm:$0xff] %vm520_vm2, %v476_v44  ;;  %vm1033_vm3 = vcmp.ge.f32.partialorder %v1001_v46, 0.0  ;;  %v1065_v50 = vmul.f32 0.2, %v1001_v46  ;;  %973 = vst.msk [vmem:[#allocation2 + $0x98] sm:$0xff] %vm520_vm2, %v941_v42  ;;  %v1497_v53 = vpack.c.bf16 %v1096_v49, %v1096_v49  ;;  %v1094_v54 = vsel %vm1030_vm1, %v998_v41, %v1062_v45  ;;  %v575_v61 = vld [vmem:[#allocation2 + $0xb0] sm:$0xff] }
 0x118   : > { %vm1031_vm4 = vcmp.ge.f32.partialorder %v999_v51, 0.0  ;;  %v1063_v55 = vmul.f32 0.2, %v999_v51  ;;  %971 = vst.msk [vmem:[#allocation2 + $0x88] sm:$0xff] %vm520_vm2, %v939_v47  ;;  %v1495_v57 = vpack.c.bf16 %v1094_v54, %v1094_v54  ;;  %v1581_v62 = vpop.f32.mrb[24].mxu0  ;;  %v944_v0 = vadd.f32 %v1613_v39, %v575_v61  ;;  %v1617_v7 = vpop.f32.mrb[24].mxu1 }
 0x119   : > { %v1097_v58 = vsel %vm1033_vm3, %v1001_v46, %v1065_v50  ;;  %1257 = vst.msk [vmem:[%s1849_s28 + $0x38] sm:$0xf] %vm1242_vm5, %v1497_v53  ;;  %v489_v2 = vpop.f32.mrb[25].mxu0  ;;  %v891_v16 = vpop.f32.mrb[25].mxu1 }
 0x11a   : > { %v1498_v59 = vpack.c.bf16 %v1097_v58, %v1097_v58  ;;  %v1095_v60 = vsel %vm1031_vm4, %v999_v51, %v1063_v55  ;;  %1255 = vst.msk [vmem:[%s1849_s28 + $0x30] sm:$0xf] %vm1242_vm5, %v1495_v57  ;;  %v1582_v6 = vpop.f32.mrb[26].mxu0  ;;  %v1618_v20 = vpop.f32.mrb[26].mxu1 }
 0x11b   : > { %v1496_v63 = vpack.c.bf16 %v1095_v60, %v1095_v60  ;;  %v573_v1 = vld [vmem:[#allocation2 + $0xa0] sm:$0xff]  ;;  %547 = vst.msk [vmem:[#allocation2 + $0xd0] sm:$0xff] %vm520_vm2, %v1581_v62  ;;  %v1004_v3 = vld [vmem:[#allocation2 + $0x90] sm:$0xff]  ;;  %545 = vst.msk [vmem:[#allocation2 + $0xc0] sm:$0xff] %vm520_vm2, %v489_v2  ;;  %v492_v12 = vpop.f32.mrb[27].mxu0  ;;  %v894_v24 = vpop.f32.mrb[27].mxu1 }
 0x11c   : > { %1258 = vst.msk [vmem:[%s1849_s28 + $0x3c] sm:$0xf] %vm1242_vm5, %v1498_v59  ;;  %v942_v4 = vadd.f32 %v875_v48, %v573_v1  ;;  %vm1036_vm6 = vcmp.ge.f32.partialorder %v1004_v3, 0.0  ;;  %v1068_v8 = vmul.f32 0.2, %v1004_v3 }
 0x11d   : > { %v576_v5 = vld [vmem:[#allocation2 + $0xb8] sm:$0xff]  ;;  %1256 = vst.msk [vmem:[%s1849_s28 + $0x34] sm:$0xf] %vm1242_vm5, %v1496_v63  ;;  %v1002_v9 = vld [vmem:[#allocation2 + $0x80] sm:$0xff] }
 0x11e   : > { %976 = vst.msk [vmem:[#allocation2 + $0xb0] sm:$0xff] %vm520_vm2, %v944_v0  ;;  %v945_v10 = vadd.f32 %v1614_v52, %v576_v5  ;;  %v574_v11 = vld [vmem:[#allocation2 + $0xa8] sm:$0xff]  ;;  %548 = vst.msk [vmem:[#allocation2 + $0xd8] sm:$0xff] %vm520_vm2, %v1582_v6  ;;  %vm1034_vm7 = vcmp.ge.f32.partialorder %v1002_v9, 0.0  ;;  %v1066_v13 = vmul.f32 0.2, %v1002_v9  ;;  %v1100_v17 = vsel %vm1036_vm6, %v1004_v3, %v1068_v8 }
 0x11f   : > { %v1005_v14 = vld [vmem:[#allocation2 + $0x98] sm:$0xff]  ;;  %974 = vst.msk [vmem:[#allocation2 + $0xa0] sm:$0xff] %vm520_vm2, %v942_v4  ;;  %v943_v15 = vadd.f32 %v878_v56, %v574_v11  ;;  %546 = vst.msk [vmem:[#allocation2 + $0xc8] sm:$0xff] %vm520_vm2, %v492_v12  ;;  %v1003_v19 = vld [vmem:[#allocation2 + $0x88] sm:$0xff]  ;;  %v1501_v21 = vpack.c.bf16 %v1100_v17, %v1100_v17  ;;  %v1585_v30 = vpop.f32.mrb[28].mxu0 }
 0x120   : > { %vm1037_vm8 = vcmp.ge.f32.partialorder %v1005_v14, 0.0  ;;  %v1069_v18 = vmul.f32 0.2, %v1005_v14  ;;  %977 = vst.msk [vmem:[#allocation2 + $0xb8] sm:$0xff] %vm520_vm2, %v945_v10  ;;  %v1098_v22 = vsel %vm1034_vm7, %v1002_v9, %v1066_v13  ;;  %vm1035_vm9 = vcmp.ge.f32.partialorder %v1003_v19, 0.0  ;;  %551 = vst.msk [vmem:[#allocation2 + $0xf0] sm:$0xff] %vm520_vm2, %v1585_v30 }
 0x121   : > { %v1067_v23 = vmul.f32 0.2, %v1003_v19  ;;  %975 = vst.msk [vmem:[#allocation2 + $0xa8] sm:$0xff] %vm520_vm2, %v943_v15  ;;  %v1499_v25 = vpack.c.bf16 %v1098_v22, %v1098_v22  ;;  %v505_v34 = vpop.f32.mrb[29].mxu0  ;;  %v1621_v39 = vpop.f32.mrb[28].mxu1 }
 0x122   : > { %v1101_v26 = vsel %vm1037_vm8, %v1005_v14, %v1069_v18  ;;  %1261 = vst.msk [vmem:[%s1849_s28 + $0x48] sm:$0xf] %vm1242_vm5, %v1501_v21  ;;  %v579_v29 = vld [vmem:[#allocation2 + $0xd0] sm:$0xff]  ;;  %v577_v33 = vld [vmem:[#allocation2 + $0xc0] sm:$0xff]  ;;  %v1586_v38 = vpop.f32.mrb[30].mxu0  ;;  %v907_v48 = vpop.f32.mrb[29].mxu1 }
 0x123   : > { %v1502_v27 = vpack.c.bf16 %v1101_v26, %v1101_v26  ;;  %v1099_v28 = vsel %vm1035_vm9, %v1003_v19, %v1067_v23  ;;  %1259 = vst.msk [vmem:[%s1849_s28 + $0x40] sm:$0xf] %vm1242_vm5, %v1499_v25  ;;  %v948_v32 = vadd.f32 %v1617_v7, %v579_v29  ;;  %v946_v36 = vadd.f32 %v891_v16, %v577_v33  ;;  %v508_v44 = vpop.f32.mrb[31].mxu0  ;;  %v1622_v52 = vpop.f32.mrb[30].mxu1 }
 0x124   : > { %v1500_v31 = vpack.c.bf16 %v1099_v28, %v1099_v28  ;;  %549 = vst.msk [vmem:[#allocation2 + $0xe0] sm:$0xff] %vm520_vm2, %v505_v34  ;;  %552 = vst.msk [vmem:[#allocation2 + $0xf8] sm:$0xff] %vm520_vm2, %v1586_v38  ;;  %v910_v56 = vpop.f32.mrb[31].mxu1 }
 0x125   : > { %1262 = vst.msk [vmem:[%s1849_s28 + $0x4c] sm:$0xf] %vm1242_vm5, %v1502_v27  ;;  %v1008_v35 = vld [vmem:[#allocation2 + $0xb0] sm:$0xff]  ;;  %v580_v37 = vld [vmem:[#allocation2 + $0xd8] sm:$0xff] }
 0x126   : > { %1260 = vst.msk [vmem:[%s1849_s28 + $0x44] sm:$0xf] %vm1242_vm5, %v1500_v31  ;;  %vm1040_vm10 = vcmp.ge.f32.partialorder %v1008_v35, 0.0  ;;  %v1072_v40 = vmul.f32 0.2, %v1008_v35  ;;  %v1006_v41 = vld [vmem:[#allocation2 + $0xa0] sm:$0xff]  ;;  %v949_v42 = vadd.f32 %v1618_v20, %v580_v37 }
 0x127   : > { %980 = vst.msk [vmem:[#allocation2 + $0xd0] sm:$0xff] %vm520_vm2, %v948_v32  ;;  %v578_v43 = vld [vmem:[#allocation2 + $0xc8] sm:$0xff]  ;;  %vm1038_vm11 = vcmp.ge.f32.partialorder %v1006_v41, 0.0  ;;  %v1070_v45 = vmul.f32 0.2, %v1006_v41  ;;  %v1009_v46 = vld [vmem:[#allocation2 + $0xb8] sm:$0xff] }
 0x128   : > { %978 = vst.msk [vmem:[#allocation2 + $0xc0] sm:$0xff] %vm520_vm2, %v946_v36  ;;  %v947_v47 = vadd.f32 %v894_v24, %v578_v43  ;;  %550 = vst.msk [vmem:[#allocation2 + $0xe8] sm:$0xff] %vm520_vm2, %v508_v44  ;;  %v1104_v49 = vsel %vm1040_vm10, %v1008_v35, %v1072_v40  ;;  %vm1041_vm12 = vcmp.ge.f32.partialorder %v1009_v46, 0.0  ;;  %v1073_v50 = vmul.f32 0.2, %v1009_v46  ;;  %v1007_v51 = vld [vmem:[#allocation2 + $0xa8] sm:$0xff] }
 0x129   : > { %981 = vst.msk [vmem:[#allocation2 + $0xd8] sm:$0xff] %vm520_vm2, %v949_v42  ;;  %v1505_v53 = vpack.c.bf16 %v1104_v49, %v1104_v49  ;;  %v1102_v54 = vsel %vm1038_vm11, %v1006_v41, %v1070_v45  ;;  %vm1039_vm13 = vcmp.ge.f32.partialorder %v1007_v51, 0.0  ;;  %v1071_v55 = vmul.f32 0.2, %v1007_v51  ;;  %v583_v61 = vld [vmem:[#allocation2 + $0xf0] sm:$0xff] }
 0x12a   : > { %979 = vst.msk [vmem:[#allocation2 + $0xc8] sm:$0xff] %vm520_vm2, %v947_v47  ;;  %v1503_v57 = vpack.c.bf16 %v1102_v54, %v1102_v54  ;;  %v1105_v58 = vsel %vm1041_vm12, %v1009_v46, %v1073_v50  ;;  %v952_v63 = vadd.f32 %v1621_v39, %v583_v61 }
 0x12b   : > { %1265 = vst.msk [vmem:[%s1849_s28 + $0x58] sm:$0xf] %vm1242_vm5, %v1505_v53  ;;  %v1506_v59 = vpack.c.bf16 %v1105_v58, %v1105_v58  ;;  %v1103_v60 = vsel %vm1039_vm13, %v1007_v51, %v1071_v55  ;;  %v581_v0 = vld [vmem:[#allocation2 + $0xe0] sm:$0xff]  ;;  %v584_v3 = vld [vmem:[#allocation2 + $0xf8] sm:$0xff] }
 0x12c   : > { %1263 = vst.msk [vmem:[%s1849_s28 + $0x50] sm:$0xf] %vm1242_vm5, %v1503_v57  ;;  %v1504_v62 = vpack.c.bf16 %v1103_v60, %v1103_v60  ;;  %v950_v2 = vadd.f32 %v907_v48, %v581_v0  ;;  %v953_v6 = vadd.f32 %v1622_v52, %v584_v3 }
 0x12d   : > { %1266 = vst.msk [vmem:[%s1849_s28 + $0x5c] sm:$0xf] %vm1242_vm5, %v1506_v59 }
 0x12e   : > { %v1012_v1 = vld [vmem:[#allocation2 + $0xd0] sm:$0xff]  ;;  %1264 = vst.msk [vmem:[%s1849_s28 + $0x54] sm:$0xf] %vm1242_vm5, %v1504_v62 }
 0x12f   : > { %vm1044_vm14 = vcmp.ge.f32.partialorder %v1012_v1, 0.0  ;;  %v1076_v4 = vmul.f32 0.2, %v1012_v1  ;;  %v1010_v5 = vld [vmem:[#allocation2 + $0xc0] sm:$0xff]  ;;  %984 = vst.msk [vmem:[#allocation2 + $0xf0] sm:$0xff] %vm520_vm2, %v952_v63  ;;  %v582_v7 = vld [vmem:[#allocation2 + $0xe8] sm:$0xff] }
 0x130   : > { %vm1042_vm15 = vcmp.ge.f32.partialorder %v1010_v5, 0.0  ;;  %v1074_v8 = vmul.f32 0.2, %v1010_v5  ;;  %v1013_v9 = vld [vmem:[#allocation2 + $0xd8] sm:$0xff]  ;;  %982 = vst.msk [vmem:[#allocation2 + $0xe0] sm:$0xff] %vm520_vm2, %v950_v2  ;;  %v951_v10 = vadd.f32 %v910_v56, %v582_v7  ;;  %985 = vst.msk [vmem:[#allocation2 + $0xf8] sm:$0xff] %vm520_vm2, %v953_v6 }
 0x131   : > { %v1108_v11 = vsel %vm1044_vm14, %v1012_v1, %v1076_v4  ;;  %vm1045_vm0 = vcmp.ge.f32.partialorder %v1013_v9, 0.0  ;;  %v1077_v12 = vmul.f32 0.2, %v1013_v9  ;;  %v1011_v13 = vld [vmem:[#allocation2 + $0xc8] sm:$0xff] }
 0x132   : > { %v1509_v14 = vpack.c.bf16 %v1108_v11, %v1108_v11  ;;  %v1106_v15 = vsel %vm1042_vm15, %v1010_v5, %v1074_v8  ;;  %vm1043_vm1 = vcmp.ge.f32.partialorder %v1011_v13, 0.0  ;;  %v1075_v16 = vmul.f32 0.2, %v1011_v13  ;;  %983 = vst.msk [vmem:[#allocation2 + $0xe8] sm:$0xff] %vm520_vm2, %v951_v10 }
 0x133   : > { %v1507_v17 = vpack.c.bf16 %v1106_v15, %v1106_v15  ;;  %v1109_v18 = vsel %vm1045_vm0, %v1013_v9, %v1077_v12 }
 0x134   : > { %1269 = vst.msk [vmem:[%s1849_s28 + $0x68] sm:$0xf] %vm1242_vm5, %v1509_v14  ;;  %v1510_v19 = vpack.c.bf16 %v1109_v18, %v1109_v18  ;;  %v1107_v20 = vsel %vm1043_vm1, %v1011_v13, %v1075_v16 }
 0x135   : > { %1267 = vst.msk [vmem:[%s1849_s28 + $0x60] sm:$0xf] %vm1242_vm5, %v1507_v17  ;;  %v1508_v21 = vpack.c.bf16 %v1107_v20, %v1107_v20 }
 0x136   : > { %1270 = vst.msk [vmem:[%s1849_s28 + $0x6c] sm:$0xf] %vm1242_vm5, %v1510_v19  ;;  %v1016_v22 = vld [vmem:[#allocation2 + $0xf0] sm:$0xff] }
 0x137   : > { %1268 = vst.msk [vmem:[%s1849_s28 + $0x64] sm:$0xf] %vm1242_vm5, %v1508_v21  ;;  %vm1048_vm3 = vcmp.ge.f32.partialorder %v1016_v22, 0.0  ;;  %v1080_v23 = vmul.f32 0.2, %v1016_v22  ;;  %v1014_v24 = vld [vmem:[#allocation2 + $0xe0] sm:$0xff] }
 0x138   : > { %vm1046_vm4 = vcmp.ge.f32.partialorder %v1014_v24, 0.0  ;;  %v1078_v25 = vmul.f32 0.2, %v1014_v24  ;;  %v1017_v26 = vld [vmem:[#allocation2 + $0xf8] sm:$0xff] }
 0x139   : > { %v1112_v27 = vsel %vm1048_vm3, %v1016_v22, %v1080_v23  ;;  %vm1049_vm2 = vcmp.ge.f32.partialorder %v1017_v26, 0.0  ;;  %v1081_v28 = vmul.f32 0.2, %v1017_v26  ;;  %v1015_v29 = vld [vmem:[#allocation2 + $0xe8] sm:$0xff] }
 0x13a   : > { %v1513_v30 = vpack.c.bf16 %v1112_v27, %v1112_v27  ;;  %v1110_v31 = vsel %vm1046_vm4, %v1014_v24, %v1078_v25  ;;  %vm1047_vm6 = vcmp.ge.f32.partialorder %v1015_v29, 0.0  ;;  %v1079_v32 = vmul.f32 0.2, %v1015_v29 }
 0x13b   : > { %v1511_v33 = vpack.c.bf16 %v1110_v31, %v1110_v31  ;;  %v1113_v34 = vsel %vm1049_vm2, %v1017_v26, %v1081_v28 }
 0x13c   : > { %1273 = vst.msk [vmem:[%s1849_s28 + $0x78] sm:$0xf] %vm1242_vm5, %v1513_v30  ;;  %v1514_v35 = vpack.c.bf16 %v1113_v34, %v1113_v34  ;;  %v1111_v36 = vsel %vm1047_vm6, %v1015_v29, %v1079_v32 }
 0x13d   : > { %1271 = vst.msk [vmem:[%s1849_s28 + $0x70] sm:$0xf] %vm1242_vm5, %v1511_v33  ;;  %v1512_v37 = vpack.c.bf16 %v1111_v36, %v1111_v36 }
 0x13e   : > { %1274 = vst.msk [vmem:[%s1849_s28 + $0x7c] sm:$0xf] %vm1242_vm5, %v1514_v35 }
 0x13f   : > { %1272 = vst.msk [vmem:[%s1849_s28 + $0x74] sm:$0xf] %vm1242_vm5, %v1512_v37 }
 0x140 PF: > { %s12_s11 = sadd.s32 1, %s1708_s11   ;;  %s1975_s9 = smov %s1704_s10 }
 0x141   : > { %p9_p5 = scmp.ge.s32.totalorder %s12_s11, 4   ;;  %s1976_s10 = smov %s1978_s12 }
 0x143   :  { %11 = sbr.rel (!%p9_p5) target bundleno = 2 (0x2), region = 62 }

// kernel: discriminator_forward.7
= control target key start
LH: loop header
LB: loop body
LE: loop exit
PB: predicated region body
PF: predicated region fallthrough
CT: control target
= control target key end

     0   :  { %s1128_s15 = smov 0   ;;  %s1130_s16 = smov 0   ;;  %s1281_s0 = inlined_call_operand.vmem [shape: bf16[2,72,128], index: 0, kind: input, shape index: {}]   ;;  %s1282_s1 = inlined_call_operand.vmem [shape: bf16[2,128,32], index: 1, kind: input, shape index: {}]   ;;  %s1283_s2 = inlined_call_operand.vmem [shape: bf16[2,64,32], index: 2, kind: output, shape index: {0}]   ;;  %s1284_s3 = inlined_call_operand.vmem [shape: f32[2,1,32], index: 3, kind: output, shape index: {1}]   ;;  %s1285_s4 = inlined_call_operand.vmem [shape: f32[2,1,32], index: 4, kind: output, shape index: {2}]  }
   0x1   :  { %s1132_s17 = smov 0  }
   0x2 LB: > { %s27_s18 = sadd.s32 1, %s1097_s16  ;;  %p895_p0 = scmp.ge.s32.totalorder %s1101_s17, 1  ;;  %s1101_s17 = sphi %s1132_s17, %s15_s17   ;;  %s1097_s16 = sphi %s1130_s16, %s1287_s16   ;;  %s1093_s15 = sphi %s1128_s15, %s1286_s15  }
   0x3   : > { %p29_p1 = scmp.ge.s32.totalorder %s27_s18, 2  ;;  %p194_p2 = scmp.lt.s32.totalorder %s1101_s17, 3 }
   0x5   : > { %s1289_s18 = smov (%p29_p1, %s27_s18), 0  ;;  %p195_p3 = pnand %p895_p0, %p194_p2 }
   0x6   : > { %v1055_v0 = vld [vmem:[%s1282_s1] sm:$0xff] (!%p195_p3)   ;;  %p239_p4 = scmp.lt.s32.totalorder (!%p195_p3), %s1093_s15, 1  ;;  %v1056_v1 = vld [vmem:[%s1282_s1 + $0x8] sm:$0xff] (!%p195_p3)   ;;  %v1058_v3 = vld [vmem:[%s1282_s1 + $0x10] sm:$0xff] (!%p195_p3)   ;;  %vm430_vm0 = vcmask (!%p195_p3), 261120   ;;  %vm665_vm1 = vcmask (!%p195_p3), 257024  }
   0x7   : > { %198 = sbr.rel (%p195_p3) target bundleno = 303 (0x12f), region = 28  ;;  %982 = vmatprep.subr.bf16.mxu0 (!%p195_p3), %v1055_v0  ;;  %v1057_v2 = vld [vmem:[%s1282_s1 + $0x40] sm:$0xff] (!%p195_p3)   ;;  %v1059_v4 = vld [vmem:[%s1282_s1 + $0x48] sm:$0xff] (!%p195_p3)   ;;  %v1061_v5 = vld [vmem:[%s1282_s1 + $0x50] sm:$0xff] (!%p195_p3)   ;;  %vm695_vm2 = vcmask (!%p195_p3), 253952  }
   0x8   : > { %983 = vmatpush3.bf16.msra.mxu0 (!%p195_p3), %v1055_v0  ;;  %1006 = vmatprep.subr.bf16.mxu1 (!%p195_p3), %v1057_v2  ;;  %v1060_v6 = vld [vmem:[%s1282_s1 + $0x18] sm:$0xff] (!%p195_p3)   ;;  %v1062_v8 = vld [vmem:[%s1282_s1 + $0x20] sm:$0xff] (!%p195_p3)   ;;  %v1064_v11 = vld [vmem:[%s1282_s1 + $0x28] sm:$0xff] (!%p195_p3)  }
   0x9   : > { %984 = vmatprep.subr.bf16.mxu0 (!%p195_p3), %v1056_v1  ;;  %1007 = vmatpush3.bf16.msra.mxu1 (!%p195_p3), %v1057_v2  ;;  %v1063_v7 = vld [vmem:[%s1282_s1 + $0x58] sm:$0xff] (!%p195_p3)   ;;  %v1065_v9 = vld [vmem:[%s1282_s1 + $0x60] sm:$0xff] (!%p195_p3)   ;;  %v1067_v12 = vld [vmem:[%s1282_s1 + $0x68] sm:$0xff] (!%p195_p3)  }
   0xa   : > { %1008 = vmatprep.subr.bf16.mxu1 (!%p195_p3), %v1059_v4  ;;  %v1066_v14 = vld [vmem:[%s1282_s1 + $0x30] sm:$0xff] (!%p195_p3)   ;;  %v1068_v16 = vld [vmem:[%s1282_s1 + $0x38] sm:$0xff] (!%p195_p3)  }
   0xb   : > { %v1069_v15 = vld [vmem:[%s1282_s1 + $0x70] sm:$0xff] (!%p195_p3)   ;;  %v1072_v17 = vld [vmem:[%s1282_s1 + $0x78] sm:$0xff] (!%p195_p3)  }
   0xc   : > { %985 = vmatpush3.bf16.msra.mxu0 (!%p195_p3), %v1056_v1 }
   0xd   : > { %986 = vmatprep.subr.bf16.mxu0 (!%p195_p3), %v1058_v3  ;;  %1009 = vmatpush3.bf16.msra.mxu1 (!%p195_p3), %v1059_v4 }
   0xe   : > { %s1291_s15 = smov (!%p239_p4, %s1093_s15), 1  ;;  %1010 = vmatprep.subr.bf16.mxu1 %v1061_v5 }
   0xf   : > { %s1030_s7 = smul.u32 36, %s1291_s15  ;;  %s261_s13 = scalar_lea.vmem %s1284_s3, %s1291_s15 }
  0x10   : > { %987 = vmatpush3.bf16.msra.mxu0 %v1058_v3  ;;  %s267_s20 = scalar_lea.vmem %s1285_s4, %s1291_s15 }
  0x11   : > { %988 = vmatprep.subr.bf16.mxu0 %v1060_v6  ;;  %s1179_s14 = scalar_lea.vmem %s1281_s0, %s1030_s7  ;;  %1011 = vmatpush3.bf16.msra.mxu1 %v1061_v5  ;;  %s949_s7 = sshll.u32 %s1291_s15, 5 }
  0x12   : > { %1012 = vmatprep.subr.bf16.mxu1 %v1063_v7  ;;  %v1070_v10 = vld [vmem:[%s1179_s14] sm:$0xff]   ;;  %v1071_v18 = vld [vmem:[%s1179_s14 + $0x8] sm:$0xff]   ;;  %v1075_v19 = vld [vmem:[%s1179_s14 + $0x10] sm:$0xff]   ;;  %s1226_s10 = scalar_lea.vmem %s1283_s2, %s949_s7 }
  0x13   : > { %998 = vmatprep.mubr.bf16.mxu0 %v1070_v10  ;;  %v1073_v13 = vld [vmem:[%s1179_s14 + $0x4] sm:$0xff]   ;;  %v1074_v20 = vld [vmem:[%s1179_s14 + $0xc] sm:$0xff]   ;;  %v1077_v21 = vld [vmem:[%s1179_s14 + $0x14] sm:$0xff]  }
  0x14   : > { %989 = vmatpush3.bf16.msra.mxu0 %v1060_v6  ;;  %1022 = vmatprep.mubr.bf16.mxu1 %v1073_v13  ;;  %v1076_v22 = vld [vmem:[%s1179_s14 + $0x18] sm:$0xff]  }
  0x15   : > { %990 = vmatprep.subr.bf16.mxu0 %v1062_v8  ;;  %1013 = vmatpush3.bf16.msra.mxu1 %v1063_v7  ;;  %v1078_v23 = vld [vmem:[%s1179_s14 + $0x1c] sm:$0xff]  }
  0x16   : > { %1014 = vmatprep.subr.bf16.mxu1 %v1065_v9 }
  0x18   : > { %991 = vmatpush3.bf16.msra.mxu0 %v1062_v8 }
  0x19   : > { %992 = vmatprep.subr.bf16.mxu0 %v1064_v11  ;;  %1015 = vmatpush3.bf16.msra.mxu1 %v1065_v9 }
  0x1a   : > { %1016 = vmatprep.subr.bf16.mxu1 %v1067_v12 }
  0x1c   : > { %993 = vmatpush3.bf16.msra.mxu0 %v1064_v11 }
  0x1d   : > { %994 = vmatprep.subr.bf16.mxu0 %v1066_v14  ;;  %1017 = vmatpush3.bf16.msra.mxu1 %v1067_v12 }
  0x1e   : > { %1018 = vmatprep.subr.bf16.mxu1 %v1069_v15 }
  0x20   : > { %995 = vmatpush3.bf16.msra.mxu0 %v1066_v14 }
  0x21   : > { %996 = vmatprep.subr.bf16.mxu0 %v1068_v16  ;;  %1019 = vmatpush3.bf16.msra.mxu1 %v1069_v15 }
  0x22   : > { %1020 = vmatprep.subr.bf16.mxu1 %v1072_v17 }
  0x24   : > { %997 = vmatpush3.bf16.msra.mxu0 %v1068_v16 }
  0x25   : > { %1021 = vmatpush3.bf16.msra.mxu1 %v1072_v17 }
  0x27   : > { %999 = vmatmul.mubr.bf16.vlgmr.msra.gmra.mrb[0].mxu0 %v1071_v18 }
  0x28   : > { %1002 = vmatprep.mubr.bf16.mxu0 %v1075_v19  ;;  %1023 = vmatmul.mubr.bf16.vlgmr.msra.gmra.mrb[0].mxu1 %v1074_v20 }
  0x29   : > { %1026 = vmatprep.mubr.bf16.mxu1 %v1077_v21 }
  0x2f   : > { %1003 = vmatmul.mubr.bf16.gmra.mrb[4].mxu0 %v1076_v22 }
  0x30   : > { %1027 = vmatmul.mubr.bf16.gmra.mrb[4].mxu1 %v1078_v23 }
  0xfa   : > { %v1000_v24 = vpop.f32.mrb[0].mxu0 }
  0xfb   : > { %433 = vst.msk [vmem:[#allocation2 + $0x10] sm:$0xff] %vm430_vm0, %v1000_v24  ;;  %v399_v25 = vpop.f32.mrb[1].mxu0  ;;  %v1024_v27 = vpop.f32.mrb[0].mxu1 }
  0xfc   : > { %431 = vst.msk [vmem:[#allocation2] sm:$0xff] %vm430_vm0, %v399_v25  ;;  %v1001_v26 = vpop.f32.mrb[2].mxu0  ;;  %v578_v29 = vpop.f32.mrb[1].mxu1 }
  0xfd   : > { %434 = vst.msk [vmem:[#allocation2 + $0x18] sm:$0xff] %vm430_vm0, %v1001_v26  ;;  %v402_v28 = vpop.f32.mrb[3].mxu0  ;;  %v1025_v30 = vpop.f32.mrb[2].mxu1 }
  0xfe   : > { %432 = vst.msk [vmem:[#allocation2 + $0x8] sm:$0xff] %vm430_vm0, %v402_v28  ;;  %v581_v31 = vpop.f32.mrb[3].mxu1 }
 0x102   : > { %v441_v32 = vld [vmem:[#allocation2 + $0x10] sm:$0xff]  ;;  %v1004_v33 = vpop.f32.mrb[4].mxu0 }
 0x103   : > { %v611_v34 = vadd.f32 %v1024_v27, %v441_v32  ;;  %v439_v35 = vld [vmem:[#allocation2] sm:$0xff]  ;;  %437 = vst.msk [vmem:[#allocation2 + $0x30] sm:$0xff] %vm430_vm0, %v1004_v33  ;;  %v415_v36 = vpop.f32.mrb[5].mxu0  ;;  %v1028_v40 = vpop.f32.mrb[4].mxu1 }
 0x104   : > { %v609_v37 = vadd.f32 %v578_v29, %v439_v35  ;;  %v442_v38 = vld [vmem:[#allocation2 + $0x18] sm:$0xff]  ;;  %435 = vst.msk [vmem:[#allocation2 + $0x20] sm:$0xff] %vm430_vm0, %v415_v36  ;;  %v1005_v39 = vpop.f32.mrb[6].mxu0  ;;  %v594_v44 = vpop.f32.mrb[5].mxu1 }
 0x105   : > { %619 = vst.msk [vmem:[#allocation2 + $0x10] sm:$0xff] %vm430_vm0, %v611_v34  ;;  %v612_v41 = vadd.f32 %v1025_v30, %v442_v38  ;;  %v440_v42 = vld [vmem:[#allocation2 + $0x8] sm:$0xff]  ;;  %438 = vst.msk [vmem:[#allocation2 + $0x38] sm:$0xff] %vm430_vm0, %v1005_v39  ;;  %v418_v43 = vpop.f32.mrb[7].mxu0  ;;  %v1029_v46 = vpop.f32.mrb[6].mxu1 }
 0x106   : > { %617 = vst.msk [vmem:[#allocation2] sm:$0xff] %vm430_vm0, %v609_v37  ;;  %v610_v45 = vadd.f32 %v581_v31, %v440_v42  ;;  %436 = vst.msk [vmem:[#allocation2 + $0x28] sm:$0xff] %vm430_vm0, %v418_v43  ;;  %v597_v47 = vpop.f32.mrb[7].mxu1 }
 0x107   : > { %620 = vst.msk [vmem:[#allocation2 + $0x18] sm:$0xff] %vm430_vm0, %v612_v41 }
 0x108   : > { %618 = vst.msk [vmem:[#allocation2 + $0x8] sm:$0xff] %vm430_vm0, %v610_v45 }
 0x10a   : > { %v445_v48 = vld [vmem:[#allocation2 + $0x30] sm:$0xff] }
 0x10b   : > { %v615_v49 = vadd.f32 %v1028_v40, %v445_v48  ;;  %v443_v50 = vld [vmem:[#allocation2 + $0x20] sm:$0xff] }
 0x10c   : > { %v627_v51 = vld [vmem:[#allocation2 + $0x10] sm:$0xff]  ;;  %v613_v52 = vadd.f32 %v594_v44, %v443_v50  ;;  %v446_v53 = vld [vmem:[#allocation2 + $0x38] sm:$0xff] }
 0x10d   : > { %v952_v54 = vpack.c.bf16 %v627_v51, %v627_v51  ;;  %v625_v55 = vld [vmem:[#allocation2] sm:$0xff]  ;;  %623 = vst.msk [vmem:[#allocation2 + $0x30] sm:$0xff] %vm430_vm0, %v615_v49  ;;  %v616_v56 = vadd.f32 %v1029_v46, %v446_v53  ;;  %v444_v57 = vld [vmem:[#allocation2 + $0x28] sm:$0xff]  ;;  %v699_v62 = vmul.f32 %v627_v51, %v627_v51  ;;  %v677_v7 = vsel %vm430_vm0, %v627_v51, 0.0 }
 0x10e   : > { %v950_v58 = vpack.c.bf16 %v625_v55, %v625_v55  ;;  %v697_v59 = vmul.f32 %v625_v55, %v625_v55  ;;  %v628_v60 = vld [vmem:[#allocation2 + $0x18] sm:$0xff]  ;;  %621 = vst.msk [vmem:[#allocation2 + $0x20] sm:$0xff] %vm430_vm0, %v613_v52  ;;  %v614_v61 = vadd.f32 %v597_v47, %v444_v57  ;;  %v674_v1 = vsel %vm430_vm0, %v625_v55, 0.0 }
 0x10f   : > { %668 = vst.msk [vmem:[%s1226_s10 + $0x8] sm:$0xf] %vm665_vm1, %v952_v54  ;;  %v953_v63 = vpack.c.bf16 %v628_v60, %v628_v60  ;;  %v626_v0 = vld [vmem:[#allocation2 + $0x8] sm:$0xff]  ;;  %v700_v5 = vmul.f32 %v628_v60, %v628_v60  ;;  %v708_v12 = vsel %vm430_vm0, %v699_v62, 0.0  ;;  %v679_v14 = vsel %vm430_vm0, %v628_v60, 0.0 }
 0x110   : > { %624 = vst.msk [vmem:[#allocation2 + $0x38] sm:$0xff] %vm430_vm0, %v616_v56  ;;  %v951_v2 = vpack.c.bf16 %v626_v0, %v626_v0  ;;  %v675_v3 = vsel %vm430_vm0, %v626_v0, 0.0  ;;  %v698_v4 = vmul.f32 %v626_v0, %v626_v0  ;;  %622 = vst.msk [vmem:[#allocation2 + $0x28] sm:$0xff] %vm430_vm0, %v614_v61  ;;  %v705_v8 = vsel %vm430_vm0, %v697_v59, 0.0 }
 0x111   : > { %666 = vst.msk [vmem:[%s1226_s10] sm:$0xf] %vm665_vm1, %v950_v58  ;;  %669 = vst.msk [vmem:[%s1226_s10 + $0xc] sm:$0xf] %vm665_vm1, %v953_v63  ;;  %v676_v6 = vadd.f32 %v675_v3, %v674_v1  ;;  %v710_v15 = vsel %vm430_vm0, %v700_v5, 0.0 }
 0x112   : > { %667 = vst.msk [vmem:[%s1226_s10 + $0x4] sm:$0xf] %vm665_vm1, %v951_v2  ;;  %v706_v9 = vsel %vm430_vm0, %v698_v4, 0.0 }
 0x113   : > { %v678_v10 = vadd.f32 %v677_v7, %v676_v6  ;;  %v707_v11 = vadd.f32 %v706_v9, %v705_v8 }
 0x114   : > { %v631_v13 = vld [vmem:[#allocation2 + $0x30] sm:$0xff] }
 0x115   : > { %v709_v16 = vadd.f32 %v708_v12, %v707_v11  ;;  %v956_v17 = vpack.c.bf16 %v631_v13, %v631_v13  ;;  %v629_v18 = vld [vmem:[#allocation2 + $0x20] sm:$0xff]  ;;  %v680_v20 = vadd.f32 %v679_v14, %v678_v10  ;;  %v703_v30 = vmul.f32 %v631_v13, %v631_v13 }
 0x116   : > { %v954_v19 = vpack.c.bf16 %v629_v18, %v629_v18  ;;  %v681_v21 = vsel %vm430_vm0, %v629_v18, 0.0  ;;  %v701_v22 = vmul.f32 %v629_v18, %v629_v18  ;;  %v685_v35 = vsel %vm430_vm0, %v631_v13, 0.0 }
 0x117   : > { %v632_v23 = vld [vmem:[#allocation2 + $0x38] sm:$0xff]  ;;  %672 = vst.msk [vmem:[%s1226_s10 + $0x18] sm:$0xf] %vm665_vm1, %v956_v17  ;;  %v711_v24 = vadd.f32 %v710_v15, %v709_v16  ;;  %v630_v26 = vld [vmem:[#allocation2 + $0x28] sm:$0xff]  ;;  %v682_v27 = vadd.f32 %v681_v21, %v680_v20  ;;  %v716_v40 = vsel %vm430_vm0, %v703_v30, 0.0 }
 0x118   : > { %v957_v25 = vpack.c.bf16 %v632_v23, %v632_v23  ;;  %670 = vst.msk [vmem:[%s1226_s10 + $0x10] sm:$0xf] %vm665_vm1, %v954_v19  ;;  %v712_v28 = vsel %vm430_vm0, %v701_v22, 0.0  ;;  %v955_v29 = vpack.c.bf16 %v630_v26, %v630_v26  ;;  %v683_v32 = vsel %vm430_vm0, %v630_v26, 0.0 }
 0x119   : > { %v713_v31 = vadd.f32 %v712_v28, %v711_v24  ;;  %v702_v33 = vmul.f32 %v630_v26, %v630_v26  ;;  %v684_v34 = vadd.f32 %v683_v32, %v682_v27  ;;  %v704_v36 = vmul.f32 %v632_v23, %v632_v23 }
 0x11a   : > { %673 = vst.msk [vmem:[%s1226_s10 + $0x1c] sm:$0xf] %vm665_vm1, %v957_v25  ;;  %671 = vst.msk [vmem:[%s1226_s10 + $0x14] sm:$0xf] %vm665_vm1, %v955_v29  ;;  %v687_v41 = vsel %vm430_vm0, %v632_v23, 0.0 }
 0x11b   : > { %v714_v37 = vsel %vm430_vm0, %v702_v33, 0.0  ;;  %v686_v38 = vadd.f32 %v685_v35, %v684_v34  ;;  %v718_v44 = vsel %vm430_vm0, %v704_v36, 0.0 }
 0x11c   : > { %v715_v39 = vadd.f32 %v714_v37, %v713_v31 }
 0x11d   : > { %v688_v42 = vadd.f32 %v687_v41, %v686_v38 }
 0x11e   : > { %v717_v43 = vadd.f32 %v716_v40, %v715_v39 }
 0x11f   : > { %v689_v45 = vrot.slane %v688_v42, 4 }
 0x120   : > { %v719_v46 = vadd.f32 %v718_v44, %v717_v43 }
 0x121   : > { %v690_v47 = vadd.f32 %v689_v45, %v688_v42 }
 0x122   : > { %v720_v48 = vrot.slane %v719_v46, 4 }
 0x123   : > { %v691_v49 = vrot.slane %v690_v47, 2 }
 0x124   : > { %v721_v50 = vadd.f32 %v720_v48, %v719_v46 }
 0x125   : > { %v692_v51 = vadd.f32 %v691_v49, %v690_v47 }
 0x126   : > { %v722_v52 = vrot.slane %v721_v50, 2 }
 0x127   : > { %v693_v53 = vrot.slane %v692_v51, 1 }
 0x128   : > { %v723_v54 = vadd.f32 %v722_v52, %v721_v50 }
 0x129   : > { %v694_v55 = vadd.f32 %v693_v53, %v692_v51 }
 0x12a   : > { %v724_v56 = vrot.slane %v723_v54, 1 }
 0x12b   : > { %696 = vst.msk [vmem:[%s261_s13] sm:$0x1] %vm695_vm2, %v694_v55 }
 0x12c   : > { %v725_v57 = vadd.f32 %v724_v56, %v723_v54 }
 0x12e   : > { %726 = vst.msk [vmem:[%s267_s20] sm:$0x1] %vm695_vm2, %v725_v57 }
 0x12f PF: > { %s15_s17 = sadd.s32 1, %s1101_s17   ;;  %s1286_s15 = smov %s1097_s16 }
 0x130   : > { %p12_p5 = scmp.ge.s32.totalorder %s15_s17, 4   ;;  %s1287_s16 = smov %s1289_s18 }
 0x132   :  { %14 = sbr.rel (!%p12_p5) target bundleno = 2 (0x2), region = 86 }

// kernel: discriminator_forward.8
= control target key start
LH: loop header
LB: loop body
LE: loop exit
PB: predicated region body
PF: predicated region fallthrough
CT: control target
= control target key end

     0   :  { %s569_s12 = smov 0   ;;  %s571_s13 = smov 0   ;;  %s633_s0 = inlined_call_operand.vmem [shape: bf16[2,64,32], index: 0, kind: input, shape index: {}]   ;;  %s634_s1 = inlined_call_operand.vmem [shape: f32[1,32], index: 1, kind: input, shape index: {}]   ;;  %s635_s2 = inlined_call_operand.vmem [shape: f32[1,32], index: 2, kind: input, shape index: {}]   ;;  %s636_s3 = inlined_call_operand.vmem [shape: bf16[2,64,32], index: 3, kind: output, shape index: {}]  }
   0x1   :  { %s573_s14 = smov 0  }
   0x2 LB: > { %s25_s15 = sadd.s32 1, %s543_s13  ;;  %p455_p0 = scmp.ge.s32.totalorder %s547_s14, 1  ;;  %s547_s14 = sphi %s573_s14, %s13_s14   ;;  %s543_s13 = sphi %s571_s13, %s638_s13   ;;  %s539_s12 = sphi %s569_s12, %s637_s12  }
   0x3   : > { %p27_p1 = scmp.ge.s32.totalorder %s25_s15, 2  ;;  %p172_p2 = scmp.lt.s32.totalorder %s547_s14, 3 }
   0x5   : > { %s640_s15 = smov (%p27_p1, %s25_s15), 0  ;;  %p173_p3 = pnand %p455_p0, %p172_p2 }
   0x6   : > { %p208_p4 = scmp.lt.s32.totalorder (!%p173_p3), %s539_s12, 1  ;;  %v460_v0 = vld [vmem:[%s634_s1] ss:$0 sm:$0xff] (!%p173_p3)  ;;  %vm332_vm0 = vcmask (!%p173_p3), 257024  }
   0x7   : > { %176 = sbr.rel (%p173_p3) target bundleno = 37 (0x25), region = 32  ;;  %v461_v9 = vld [vmem:[%s635_s2] ss:$0 sm:$0xff] (!%p173_p3) }
   0xe   : > { %s642_s12 = smov (!%p208_p4, %s539_s12), 1 }
   0xf   : > { %s472_s16 = sshll.u32 %s642_s12, 5 }
  0x10   : > { %s215_s19 = scalar_lea.vmem %s633_s0, %s472_s16  ;;  %s606_s26 = scalar_lea.vmem %s636_s3, %s472_s16 }
  0x11   : > { %v483_v1 = vld [vmem:[%s215_s19] sm:$0xff]   ;;  %v498_v2 = vld [vmem:[%s215_s19 + $0x8] sm:$0xff]   ;;  %v499_v3 = vld [vmem:[%s215_s19 + $0x10] sm:$0xff]  }
  0x12   : > { %v484_v4 = vunpack.c.l.bf16 %v483_v1  ;;  %v485_v5 = vunpack.c.h.bf16 %v483_v1  ;;  %v488_v6 = vunpack.c.l.bf16 %v498_v2  ;;  %v489_v7 = vunpack.c.h.bf16 %v498_v2  ;;  %v500_v8 = vld [vmem:[%s215_s19 + $0x18] sm:$0xff]  }
  0x13   : > { %v492_v10 = vunpack.c.l.bf16 %v499_v3  ;;  %v493_v11 = vunpack.c.h.bf16 %v499_v3  ;;  %v496_v12 = vunpack.c.l.bf16 %v500_v8  ;;  %v497_v13 = vunpack.c.h.bf16 %v500_v8 }
  0x14   : > { %v253_v14 = vmul.f32 %v484_v4, %v460_v0  ;;  %v254_v15 = vmul.f32 %v485_v5, %v460_v0  ;;  %v255_v16 = vmul.f32 %v488_v6, %v460_v0  ;;  %v256_v17 = vmul.f32 %v489_v7, %v460_v0 }
  0x15   : > { %v257_v18 = vmul.f32 %v492_v10, %v460_v0  ;;  %v258_v19 = vmul.f32 %v493_v11, %v460_v0  ;;  %v259_v20 = vmul.f32 %v496_v12, %v460_v0  ;;  %v260_v21 = vmul.f32 %v497_v13, %v460_v0 }
  0x16   : > { %v268_v22 = vadd.f32 %v461_v9, %v253_v14  ;;  %v269_v23 = vadd.f32 %v461_v9, %v254_v15  ;;  %v270_v24 = vadd.f32 %v461_v9, %v255_v16  ;;  %v271_v25 = vadd.f32 %v461_v9, %v256_v17 }
  0x17   : > { %v272_v26 = vadd.f32 %v461_v9, %v257_v18  ;;  %v273_v27 = vadd.f32 %v461_v9, %v258_v19  ;;  %v274_v28 = vadd.f32 %v461_v9, %v259_v20  ;;  %v275_v29 = vadd.f32 %v461_v9, %v260_v21 }
  0x18   : > { %vm276_vm1 = vcmp.ge.f32.partialorder %v268_v22, 0.0  ;;  %v284_v30 = vmul.f32 0.2, %v268_v22  ;;  %vm277_vm2 = vcmp.ge.f32.partialorder %v269_v23, 0.0  ;;  %v285_v31 = vmul.f32 0.2, %v269_v23 }
  0x19   : > { %vm278_vm3 = vcmp.ge.f32.partialorder %v270_v24, 0.0  ;;  %v286_v32 = vmul.f32 0.2, %v270_v24  ;;  %vm279_vm4 = vcmp.ge.f32.partialorder %v271_v25, 0.0  ;;  %v287_v33 = vmul.f32 0.2, %v271_v25 }
  0x1a   : > { %v292_v34 = vsel %vm276_vm1, %v268_v22, %v284_v30  ;;  %v293_v35 = vsel %vm277_vm2, %v269_v23, %v285_v31  ;;  %vm280_vm5 = vcmp.ge.f32.partialorder %v272_v26, 0.0  ;;  %v288_v36 = vmul.f32 0.2, %v272_v26 }
  0x1b   : > { %v474_v37 = vpack.c.bf16 %v292_v34, %v292_v34  ;;  %v475_v38 = vpack.c.bf16 %v293_v35, %v293_v35  ;;  %v294_v39 = vsel %vm278_vm3, %v270_v24, %v286_v32  ;;  %v295_v40 = vsel %vm279_vm4, %v271_v25, %v287_v33 }
  0x1c   : > { %v476_v41 = vpack.c.bf16 %v294_v39, %v294_v39  ;;  %v477_v42 = vpack.c.bf16 %v295_v40, %v295_v40  ;;  %v296_v43 = vsel %vm280_vm5, %v272_v26, %v288_v36  ;;  %vm281_vm6 = vcmp.ge.f32.partialorder %v273_v27, 0.0 }
  0x1d   : > { %333 = vst.msk [vmem:[%s606_s26] sm:$0xf] %vm332_vm0, %v474_v37  ;;  %334 = vst.msk [vmem:[%s606_s26 + $0x4] sm:$0xf] %vm332_vm0, %v475_v38  ;;  %v478_v44 = vpack.c.bf16 %v296_v43, %v296_v43  ;;  %v289_v45 = vmul.f32 0.2, %v273_v27 }
  0x1e   : > { %vm282_vm7 = vcmp.ge.f32.partialorder %v274_v28, 0.0  ;;  %v290_v46 = vmul.f32 0.2, %v274_v28  ;;  %335 = vst.msk [vmem:[%s606_s26 + $0x8] sm:$0xf] %vm332_vm0, %v476_v41  ;;  %vm283_vm8 = vcmp.ge.f32.partialorder %v275_v29, 0.0 }
  0x1f   : > { %336 = vst.msk [vmem:[%s606_s26 + $0xc] sm:$0xf] %vm332_vm0, %v477_v42  ;;  %v291_v47 = vmul.f32 0.2, %v275_v29  ;;  %337 = vst.msk [vmem:[%s606_s26 + $0x10] sm:$0xf] %vm332_vm0, %v478_v44  ;;  %v297_v48 = vsel %vm281_vm6, %v273_v27, %v289_v45 }
  0x20   : > { %v298_v49 = vsel %vm282_vm7, %v274_v28, %v290_v46  ;;  %v479_v50 = vpack.c.bf16 %v297_v48, %v297_v48 }
  0x21   : > { %v480_v51 = vpack.c.bf16 %v298_v49, %v298_v49  ;;  %v299_v52 = vsel %vm283_vm8, %v275_v29, %v291_v47 }
  0x22   : > { %v481_v53 = vpack.c.bf16 %v299_v52, %v299_v52  ;;  %338 = vst.msk [vmem:[%s606_s26 + $0x14] sm:$0xf] %vm332_vm0, %v479_v50 }
  0x23   : > { %339 = vst.msk [vmem:[%s606_s26 + $0x18] sm:$0xf] %vm332_vm0, %v480_v51 }
  0x24   : > { %340 = vst.msk [vmem:[%s606_s26 + $0x1c] sm:$0xf] %vm332_vm0, %v481_v53 }
  0x25 PF: > { %s13_s14 = sadd.s32 1, %s547_s14   ;;  %s637_s12 = smov %s543_s13 }
  0x26   : > { %p10_p5 = scmp.ge.s32.totalorder %s13_s14, 4   ;;  %s638_s13 = smov %s640_s15 }
  0x28   :  { %12 = sbr.rel (!%p10_p5) target bundleno = 2 (0x2), region = 68 }

// kernel: discriminator_forward.10
= control target key start
LH: loop header
LB: loop body
LE: loop exit
PB: predicated region body
PF: predicated region fallthrough
CT: control target
= control target key end

     0   :  { %s470_s12 = smov 0   ;;  %s472_s13 = smov 0   ;;  %s509_s0 = inlined_call_operand.vmem [shape: bf16[2,16,64], index: 0, kind: input, shape index: {}]   ;;  %s510_s1 = inlined_call_operand.vmem [shape: f32[1,64], index: 1, kind: input, shape index: {}]   ;;  %s511_s2 = inlined_call_operand.vmem [shape: f32[1,64], index: 2, kind: input, shape index: {}]   ;;  %s512_s3 = inlined_call_operand.vmem [shape: bf16[2,16,64], index: 3, kind: output, shape index: {}]  }
   0x1   :  { %s474_s14 = smov 0  }
   0x2 LB: > { %s25_s15 = sadd.s32 1, %s444_s13  ;;  %p383_p0 = scmp.ge.s32.totalorder %s448_s14, 1  ;;  %s448_s14 = sphi %s474_s14, %s13_s14   ;;  %s444_s13 = sphi %s472_s13, %s514_s13   ;;  %s440_s12 = sphi %s470_s12, %s513_s12  }
   0x3   : > { %p27_p1 = scmp.ge.s32.totalorder %s25_s15, 2  ;;  %p172_p2 = scmp.lt.s32.totalorder %s448_s14, 3 }
   0x5   : > { %s516_s15 = smov (%p27_p1, %s25_s15), 0  ;;  %p173_p3 = pnand %p383_p0, %p172_p2 }
   0x6   : > { %p208_p4 = scmp.lt.s32.totalorder (!%p173_p3), %s440_s12, 1  ;;  %v388_v1 = vld [vmem:[%s510_s1] ss:$0 sm:$0xff] (!%p173_p3)  ;;  %vm266_vm2 = vcmask (!%p173_p3), 519168  }
   0x7   : > { %176 = sbr.rel (%p173_p3) target bundleno = 30 (0x1e), region = 32  ;;  %v389_v4 = vld [vmem:[%s511_s2] ss:$0 sm:$0xff] (!%p173_p3) }
   0xe   : > { %s518_s12 = smov (!%p208_p4, %s440_s12), 1 }
   0xf   : > { %s394_s16 = sshll.u32 %s518_s12, 3 }
  0x10   : > { %s215_s19 = scalar_lea.vmem %s509_s0, %s394_s16  ;;  %s229_s26 = scalar_lea.vmem %s512_s3, %s394_s16 }
  0x11   : > { %v399_v0 = vld [vmem:[%s215_s19] sm:$0xff]  }
  0x12   : > { %v400_v2 = vunpack.c.l.bf16 %v399_v0  ;;  %v401_v3 = vunpack.c.h.bf16 %v399_v0 }
  0x14   : > { %v241_v5 = vmul.f32 %v400_v2, %v388_v1  ;;  %v242_v6 = vmul.f32 %v401_v3, %v388_v1 }
  0x16   : > { %v250_v7 = vadd.f32 %v389_v4, %v241_v5  ;;  %v251_v8 = vadd.f32 %v389_v4, %v242_v6 }
  0x18   : > { %vm252_vm0 = vcmp.ge.f32.partialorder %v250_v7, 0.0  ;;  %v254_v9 = vmul.f32 0.2, %v250_v7  ;;  %vm253_vm1 = vcmp.ge.f32.partialorder %v251_v8, 0.0  ;;  %v255_v10 = vmul.f32 0.2, %v251_v8 }
  0x1a   : > { %v256_v11 = vsel %vm252_vm0, %v250_v7, %v254_v9  ;;  %v257_v12 = vsel %vm253_vm1, %v251_v8, %v255_v10 }
  0x1b   : > { %v396_v13 = vpack.c.bf16 %v256_v11, %v256_v11  ;;  %v397_v14 = vpack.c.bf16 %v257_v12, %v257_v12 }
  0x1d   : > { %267 = vst.msk [vmem:[%s229_s26] sm:$0xf] %vm266_vm2, %v396_v13  ;;  %268 = vst.msk [vmem:[%s229_s26 + $0x4] sm:$0xf] %vm266_vm2, %v397_v14 }
  0x1e PF: > { %s13_s14 = sadd.s32 1, %s448_s14   ;;  %s513_s12 = smov %s444_s13 }
  0x1f   : > { %p10_p5 = scmp.ge.s32.totalorder %s13_s14, 4   ;;  %s514_s13 = smov %s516_s15 }
  0x21   :  { %12 = sbr.rel (!%p10_p5) target bundleno = 2 (0x2), region = 68 }

// kernel: discriminator_forward.9
= control target key start
LH: loop header
LB: loop body
LE: loop exit
PB: predicated region body
PF: predicated region fallthrough
CT: control target
= control target key end

     0   :  { %s1095_s15 = smov 0   ;;  %s1097_s16 = smov 0   ;;  %s1248_s0 = inlined_call_operand.vmem [shape: bf16[2,20,256], index: 0, kind: input, shape index: {}]   ;;  %s1249_s1 = inlined_call_operand.vmem [shape: bf16[2,256,64], index: 1, kind: input, shape index: {}]   ;;  %s1250_s2 = inlined_call_operand.vmem [shape: bf16[2,16,64], index: 2, kind: output, shape index: {0}]   ;;  %s1251_s3 = inlined_call_operand.vmem [shape: f32[2,1,64], index: 3, kind: output, shape index: {1}]   ;;  %s1252_s4 = inlined_call_operand.vmem [shape: f32[2,1,64], index: 4, kind: output, shape index: {2}]  }
   0x1   :  { %s1099_s17 = smov 0  }
   0x2 LB: > { %s27_s18 = sadd.s32 1, %s1064_s16  ;;  %p858_p0 = scmp.ge.s32.totalorder %s1068_s17, 1  ;;  %s1068_s17 = sphi %s1099_s17, %s15_s17   ;;  %s1064_s16 = sphi %s1097_s16, %s1254_s16   ;;  %s1060_s15 = sphi %s1095_s15, %s1253_s15  }
   0x3   : > { %p29_p1 = scmp.ge.s32.totalorder %s27_s18, 2  ;;  %p194_p2 = scmp.lt.s32.totalorder %s1068_s17, 3 }
   0x5   : > { %s1256_s18 = smov (%p29_p1, %s27_s18), 0  ;;  %p195_p3 = pnand %p858_p0, %p194_p2 }
   0x6   : > { %v1008_v0 = vld [vmem:[%s1249_s1 + $0x40] sm:$0xff] (!%p195_p3)   ;;  %v1010_v2 = vld [vmem:[%s1249_s1 + $0x48] sm:$0xff] (!%p195_p3)   ;;  %v1014_v6 = vld [vmem:[%s1249_s1 + $0x50] sm:$0xff] (!%p195_p3)   ;;  %p239_p4 = scmp.lt.s32.totalorder (!%p195_p3), %s1060_s15, 1  ;;  %vm504_vm0 = vcmask (!%p195_p3), 1045504   ;;  %vm450_vm1 = vcmask (!%p195_p3), 523264  }
   0x7   : > { %198 = sbr.rel (%p195_p3) target bundleno = 292 (0x124), region = 28  ;;  %v1009_v1 = vld [vmem:[%s1249_s1] sm:$0xff] (!%p195_p3)   ;;  %939 = vmatprep.subr.bf16.mxu0 (!%p195_p3), %v1008_v0  ;;  %v1011_v3 = vld [vmem:[%s1249_s1 + $0x8] sm:$0xff] (!%p195_p3)   ;;  %v1015_v7 = vld [vmem:[%s1249_s1 + $0x10] sm:$0xff] (!%p195_p3)   ;;  %vm664_vm2 = vcmask (!%p195_p3), 519168   ;;  %vm676_vm3 = vcmask (!%p195_p3), 516096  }
   0x8   : > { %940 = vmatpush3.bf16.msra.mxu0 (!%p195_p3), %v1009_v1  ;;  %v1012_v4 = vld [vmem:[%s1249_s1 + $0xc0] sm:$0xff] (!%p195_p3)   ;;  %v1016_v8 = vld [vmem:[%s1249_s1 + $0xc8] sm:$0xff] (!%p195_p3)   ;;  %v1018_v10 = vld [vmem:[%s1249_s1 + $0x58] sm:$0xff] (!%p195_p3)  }
   0x9   : > { %941 = vmatprep.subr.bf16.mxu0 (!%p195_p3), %v1010_v2  ;;  %v1013_v5 = vld [vmem:[%s1249_s1 + $0x80] sm:$0xff] (!%p195_p3)   ;;  %961 = vmatprep.subr.bf16.mxu1 (!%p195_p3), %v1012_v4  ;;  %v1017_v9 = vld [vmem:[%s1249_s1 + $0x88] sm:$0xff] (!%p195_p3)   ;;  %v1019_v11 = vld [vmem:[%s1249_s1 + $0x18] sm:$0xff] (!%p195_p3)  }
   0xa   : > { %962 = vmatpush3.bf16.msra.mxu1 (!%p195_p3), %v1013_v5  ;;  %v1020_v12 = vld [vmem:[%s1249_s1 + $0xd0] sm:$0xff] (!%p195_p3)   ;;  %v1022_v14 = vld [vmem:[%s1249_s1 + $0x60] sm:$0xff] (!%p195_p3)   ;;  %v1024_v16 = vld [vmem:[%s1249_s1 + $0xd8] sm:$0xff] (!%p195_p3)  }
   0xb   : > { %963 = vmatprep.subr.bf16.mxu1 (!%p195_p3), %v1016_v8  ;;  %v1021_v13 = vld [vmem:[%s1249_s1 + $0x90] sm:$0xff] (!%p195_p3)   ;;  %v1023_v15 = vld [vmem:[%s1249_s1 + $0x20] sm:$0xff] (!%p195_p3)   ;;  %v1025_v17 = vld [vmem:[%s1249_s1 + $0x98] sm:$0xff] (!%p195_p3)  }
   0xc   : > { %942 = vmatpush3.bf16.msra.mxu0 (!%p195_p3), %v1011_v3  ;;  %v1026_v18 = vld [vmem:[%s1249_s1 + $0x68] sm:$0xff] (!%p195_p3)   ;;  %v1028_v20 = vld [vmem:[%s1249_s1 + $0xe0] sm:$0xff] (!%p195_p3)   ;;  %v1030_v22 = vld [vmem:[%s1249_s1 + $0x70] sm:$0xff] (!%p195_p3)  }
   0xd   : > { %943 = vmatprep.subr.bf16.mxu0 (!%p195_p3), %v1014_v6  ;;  %v1027_v19 = vld [vmem:[%s1249_s1 + $0x28] sm:$0xff] (!%p195_p3)   ;;  %v1029_v21 = vld [vmem:[%s1249_s1 + $0xa0] sm:$0xff] (!%p195_p3)   ;;  %v1031_v23 = vld [vmem:[%s1249_s1 + $0x30] sm:$0xff] (!%p195_p3)  }
   0xe   : > { %964 = vmatpush3.bf16.msra.mxu1 %v1017_v9  ;;  %s1258_s15 = smov (!%p239_p4, %s1060_s15), 1  ;;  %v1032_v24 = vld [vmem:[%s1249_s1 + $0xe8] sm:$0xff]   ;;  %v1034_v26 = vld [vmem:[%s1249_s1 + $0x78] sm:$0xff]   ;;  %v1036_v28 = vld [vmem:[%s1249_s1 + $0xf0] sm:$0xff]  }
   0xf   : > { %965 = vmatprep.subr.bf16.mxu1 %v1020_v12  ;;  %s983_s23 = smul.u32 24, %s1258_s15  ;;  %v1033_v25 = vld [vmem:[%s1249_s1 + $0xa8] sm:$0xff]   ;;  %v1035_v27 = vld [vmem:[%s1249_s1 + $0x38] sm:$0xff]   ;;  %v1037_v29 = vld [vmem:[%s1249_s1 + $0xb0] sm:$0xff]   ;;  %s936_s21 = sshll.u32 %s1258_s15, 3 }
  0x10   : > { %944 = vmatpush3.bf16.msra.mxu0 %v1015_v7  ;;  %v1040_v34 = vld [vmem:[%s1249_s1 + $0xf8] sm:$0xff]   ;;  %s255_s24 = scalar_lea.vmem %s1250_s2, %s936_s21  ;;  %s261_s27 = scalar_lea.vmem %s1251_s3, %s1258_s15 }
  0x11   : > { %945 = vmatprep.subr.bf16.mxu0 %v1018_v10  ;;  %s243_s8 = scalar_lea.vmem %s1248_s0, %s983_s23  ;;  %v1041_v35 = vld [vmem:[%s1249_s1 + $0xb8] sm:$0xff]   ;;  %s267_s30 = scalar_lea.vmem %s1252_s4, %s1258_s15 }
  0x12   : > { %966 = vmatpush3.bf16.msra.mxu1 %v1021_v13  ;;  %v269_v30 = vld [vmem:[%s243_s8] sm:$0xff]  ;;  %v270_v31 = vld [vmem:[%s243_s8 + $0x8] sm:$0xff]  ;;  %v457_v37 = vld [vmem:[%s243_s8 + $0x10] sm:$0x33] }
  0x13   : > { %967 = vmatprep.subr.bf16.mxu1 %v1024_v16  ;;  %v862_v32 = vcombine.low %v269_v30, %v270_v31  ;;  %v863_v33 = vcombine.high %v269_v30, %v270_v31  ;;  %v455_v36 = vld [vmem:[%s243_s8] sm:$0xcc]  ;;  %v915_v40 = vcombine.high %v457_v37, %v457_v37  ;;  %v914_v41 = vcombine.low %v457_v37, %v457_v37 }
  0x14   : > { %946 = vmatpush3.bf16.msra.mxu0 %v1019_v11  ;;  %v913_v38 = vcombine.high %v455_v36, %v270_v31  ;;  %v912_v39 = vcombine.low %v455_v36, %v270_v31 }
  0x15   : > { %947 = vmatprep.subr.bf16.mxu0 %v1022_v14  ;;  %441 = vmatprep.mubr.bf16.mxu0 %v863_v33  ;;  %v509_v44 = vrot.slane %v915_v40, 2  ;;  %v506_v45 = vrot.slane %v914_v41, 2 }
  0x16   : > { %968 = vmatpush3.bf16.msra.mxu1 %v1025_v17  ;;  %v508_v42 = vrot.slane %v913_v38, 2  ;;  %v505_v43 = vrot.slane %v912_v39, 2 }
  0x17   : > { %969 = vmatprep.subr.bf16.mxu1 %v1028_v20 }
  0x18   : > { %948 = vmatpush3.bf16.msra.mxu0 %v1023_v15  ;;  %v510_v46 = vsel %vm504_vm0, %v508_v42, %v509_v44  ;;  %v507_v47 = vsel %vm504_vm0, %v505_v43, %v506_v45 }
  0x19   : > { %949 = vmatprep.subr.bf16.mxu0 %v1026_v18  ;;  %641 = vmatprep.mubr.bf16.mxu1 %v510_v46 }
  0x1a   : > { %970 = vmatpush3.bf16.msra.mxu1 %v1029_v21 }
  0x1b   : > { %971 = vmatprep.subr.bf16.mxu1 %v1032_v24 }
  0x1c   : > { %950 = vmatpush3.bf16.msra.mxu0 %v1027_v19 }
  0x1d   : > { %951 = vmatprep.subr.bf16.mxu0 %v1030_v22 }
  0x1e   : > { %972 = vmatpush3.bf16.msra.mxu1 %v1033_v25 }
  0x1f   : > { %973 = vmatprep.subr.bf16.mxu1 %v1036_v28 }
  0x20   : > { %952 = vmatpush3.bf16.msra.mxu0 %v1031_v23 }
  0x21   : > { %953 = vmatprep.subr.bf16.mxu0 %v1034_v26 }
  0x22   : > { %974 = vmatpush3.bf16.msra.mxu1 %v1037_v29 }
  0x23   : > { %975 = vmatprep.subr.bf16.mxu1 %v1040_v34 }
  0x24   : > { %954 = vmatpush3.bf16.msra.mxu0 %v1035_v27 }
  0x26   : > { %976 = vmatpush3.bf16.msra.mxu1 %v1041_v35 }
  0x27   : > { %442 = vmatmul.mubr.bf16.vlgmr.msra.gmra.mrb[0].mxu0 %v862_v32 }
  0x29   : > { %642 = vmatmul.mubr.bf16.vlgmr.msra.gmra.mrb[0].mxu1 %v507_v47 }
  0xfa   : > { %v955_v48 = vpop.f32.mrb[0].mxu0 }
  0xfb   : > { %v956_v49 = vpop.f32.mrb[1].mxu0 }
  0xfc   : > { %v957_v50 = vadd.f32 %v956_v49, %v955_v48  ;;  %v958_v51 = vpop.f32.mrb[2].mxu0  ;;  %v977_v54 = vpop.f32.mrb[0].mxu1 }
  0xfd   : > { %v959_v52 = vpop.f32.mrb[3].mxu0  ;;  %v978_v55 = vpop.f32.mrb[1].mxu1 }
  0xfe   : > { %451 = vst.msk [vmem:[#allocation2] sm:$0xff] %vm450_vm1, %v957_v50  ;;  %v960_v53 = vadd.f32 %v959_v52, %v958_v51  ;;  %v979_v56 = vadd.f32 %v978_v55, %v977_v54  ;;  %v980_v57 = vpop.f32.mrb[2].mxu1 }
  0xff   : > { %v981_v58 = vpop.f32.mrb[3].mxu1 }
 0x100   : > { %452 = vst.msk [vmem:[#allocation2 + $0x8] sm:$0xff] %vm450_vm1, %v960_v53  ;;  %v982_v59 = vadd.f32 %v981_v58, %v980_v57 }
 0x105   : > { %v453_v60 = vld [vmem:[#allocation2] sm:$0xff] }
 0x106   : > { %v650_v61 = vadd.f32 %v979_v56, %v453_v60 }
 0x107   : > { %v454_v62 = vld [vmem:[#allocation2 + $0x8] sm:$0xff] }
 0x108   : > { %652 = vst.msk [vmem:[#allocation2] sm:$0xff] %vm450_vm1, %v650_v61  ;;  %v651_v63 = vadd.f32 %v982_v59, %v454_v62 }
 0x10a   : > { %653 = vst.msk [vmem:[#allocation2 + $0x8] sm:$0xff] %vm450_vm1, %v651_v63 }
 0x10f   : > { %v654_v0 = vld [vmem:[#allocation2] sm:$0xff] }
 0x110   : > { %v937_v1 = vpack.c.bf16 %v654_v0, %v654_v0  ;;  %v678_v2 = vmul.f32 %v654_v0, %v654_v0  ;;  %v667_v4 = vsel %vm450_vm1, %v654_v0, 0.0 }
 0x111   : > { %v655_v3 = vld [vmem:[#allocation2 + $0x8] sm:$0xff] }
 0x112   : > { %665 = vst.msk [vmem:[%s255_s24] sm:$0xf] %vm664_vm2, %v937_v1  ;;  %v938_v5 = vpack.c.bf16 %v655_v3, %v655_v3  ;;  %v668_v6 = vsel %vm450_vm1, %v655_v3, 0.0  ;;  %v679_v7 = vmul.f32 %v655_v3, %v655_v3  ;;  %v680_v9 = vsel %vm450_vm1, %v678_v2, 0.0 }
 0x113   : > { %v669_v8 = vadd.f32 %v668_v6, %v667_v4 }
 0x114   : > { %666 = vst.msk [vmem:[%s255_s24 + $0x4] sm:$0xf] %vm664_vm2, %v938_v5  ;;  %v681_v10 = vsel %vm450_vm1, %v679_v7, 0.0 }
 0x115   : > { %v670_v11 = vrot.slane %v669_v8, 4  ;;  %v682_v12 = vadd.f32 %v681_v10, %v680_v9 }
 0x117   : > { %v671_v13 = vadd.f32 %v670_v11, %v669_v8  ;;  %v683_v14 = vrot.slane %v682_v12, 4 }
 0x119   : > { %v672_v15 = vrot.slane %v671_v13, 2  ;;  %v684_v16 = vadd.f32 %v683_v14, %v682_v12 }
 0x11b   : > { %v673_v17 = vadd.f32 %v672_v15, %v671_v13  ;;  %v685_v18 = vrot.slane %v684_v16, 2 }
 0x11d   : > { %v674_v19 = vrot.slane %v673_v17, 1  ;;  %v686_v20 = vadd.f32 %v685_v18, %v684_v16 }
 0x11f   : > { %v675_v21 = vadd.f32 %v674_v19, %v673_v17  ;;  %v687_v22 = vrot.slane %v686_v20, 1 }
 0x121   : > { %677 = vst.msk [vmem:[%s261_s27] sm:$0x1] %vm676_vm3, %v675_v21  ;;  %v688_v23 = vadd.f32 %v687_v22, %v686_v20 }
 0x123   : > { %689 = vst.msk [vmem:[%s267_s30] sm:$0x1] %vm676_vm3, %v688_v23 }
 0x124 PF: > { %s15_s17 = sadd.s32 1, %s1068_s17   ;;  %s1253_s15 = smov %s1064_s16 }
 0x125   : > { %p12_p5 = scmp.ge.s32.totalorder %s15_s17, 4   ;;  %s1254_s16 = smov %s1256_s18 }
 0x127   :  { %14 = sbr.rel (!%p12_p5) target bundleno = 2 (0x2), region = 86 }

// kernel: discriminator_forward.11
= control target key start
LH: loop header
LB: loop body
LE: loop exit
PB: predicated region body
PF: predicated region fallthrough
CT: control target
= control target key end

     0   :  { %s1400_s9 = smov 0   ;;  %s1402_s10 = smov 0   ;;  %s1637_s0 = inlined_call_operand.vmem [shape: bf16[2,4,256], index: 0, kind: input, shape index: {}]   ;;  %s1638_s1 = inlined_call_operand.vmem [shape: bf16[4,256,128], index: 1, kind: input, shape index: {}]   ;;  %s1639_s2 = inlined_call_operand.vmem [shape: f32[2,1,128], index: 2, kind: output, shape index: {}]  }
   0x1   :  { %s1404_s11 = smov 0  }
   0x2 LB: > { %s24_s12 = sadd.s32 1, %s1379_s10  ;;  %p1015_p0 = scmp.ge.s32.totalorder %s1383_s11, 1  ;;  %s1383_s11 = sphi %s1404_s11, %s12_s11   ;;  %s1379_s10 = sphi %s1402_s10, %s1641_s10   ;;  %s1375_s9 = sphi %s1400_s9, %s1640_s9  }
   0x3   : > { %p26_p1 = scmp.ge.s32.totalorder %s24_s12, 2  ;;  %p135_p2 = scmp.lt.s32.totalorder %s1383_s11, 3 }
   0x5   : > { %s1643_s12 = smov (%p26_p1, %s24_s12), 0  ;;  %p136_p3 = pnand %p1015_p0, %p135_p2 }
   0x6   : > { %v1297_v0 = vld [vmem:[%s1638_s1 + $0x40] sm:$0xff] (!%p136_p3)   ;;  %v1299_v2 = vld [vmem:[%s1638_s1 + $0x48] sm:$0xff] (!%p136_p3)   ;;  %v1302_v5 = vld [vmem:[%s1638_s1 + $0x50] sm:$0xff] (!%p136_p3)   ;;  %p162_p4 = scmp.lt.s32.totalorder (!%p136_p3), %s1375_s9, 1 }
   0x7   : > { %139 = sbr.rel (%p136_p3) target bundleno = 307 (0x133), region = 28  ;;  %v1298_v1 = vld [vmem:[%s1638_s1] sm:$0xff] (!%p136_p3)   ;;  %1185 = vmatprep.subr.bf16.mxu0 (!%p136_p3), %v1297_v0  ;;  %v1300_v3 = vld [vmem:[%s1638_s1 + $0x8] sm:$0xff] (!%p136_p3)   ;;  %v1304_v7 = vld [vmem:[%s1638_s1 + $0x10] sm:$0xff] (!%p136_p3)  }
   0x8   : > { %1186 = vmatpush3.bf16.msra.mxu0 (!%p136_p3), %v1298_v1  ;;  %v1301_v4 = vld [vmem:[%s1638_s1 + $0xc0] sm:$0xff] (!%p136_p3)   ;;  %v1305_v8 = vld [vmem:[%s1638_s1 + $0xc8] sm:$0xff] (!%p136_p3)   ;;  %v1306_v9 = vld [vmem:[%s1638_s1 + $0x58] sm:$0xff] (!%p136_p3)  }
   0x9   : > { %1187 = vmatprep.subr.bf16.mxu0 (!%p136_p3), %v1299_v2  ;;  %1207 = vmatprep.subr.bf16.mxu1 (!%p136_p3), %v1301_v4  ;;  %v1303_v6 = vld [vmem:[%s1638_s1 + $0x80] sm:$0xff] (!%p136_p3)   ;;  %v1307_v10 = vld [vmem:[%s1638_s1 + $0x88] sm:$0xff] (!%p136_p3)   ;;  %v1308_v11 = vld [vmem:[%s1638_s1 + $0x18] sm:$0xff] (!%p136_p3)  }
   0xa   : > { %1208 = vmatpush3.bf16.msra.mxu1 (!%p136_p3), %v1303_v6  ;;  %v1309_v12 = vld [vmem:[%s1638_s1 + $0xd0] sm:$0xff] (!%p136_p3)   ;;  %v1310_v13 = vld [vmem:[%s1638_s1 + $0x60] sm:$0xff] (!%p136_p3)   ;;  %v1313_v16 = vld [vmem:[%s1638_s1 + $0xd8] sm:$0xff] (!%p136_p3)  }
   0xb   : > { %1209 = vmatprep.subr.bf16.mxu1 (!%p136_p3), %v1305_v8  ;;  %v1311_v14 = vld [vmem:[%s1638_s1 + $0x90] sm:$0xff] (!%p136_p3)   ;;  %v1312_v15 = vld [vmem:[%s1638_s1 + $0x20] sm:$0xff] (!%p136_p3)   ;;  %v1314_v17 = vld [vmem:[%s1638_s1 + $0x68] sm:$0xff] (!%p136_p3)  }
   0xc   : > { %1188 = vmatpush3.bf16.msra.mxu0 (!%p136_p3), %v1300_v3  ;;  %v1315_v18 = vld [vmem:[%s1638_s1 + $0x98] sm:$0xff] (!%p136_p3)   ;;  %v1316_v19 = vld [vmem:[%s1638_s1 + $0x28] sm:$0xff] (!%p136_p3)   ;;  %v1317_v20 = vld [vmem:[%s1638_s1 + $0xe0] sm:$0xff] (!%p136_p3)  }
   0xd   : > { %1189 = vmatprep.subr.bf16.mxu0 (!%p136_p3), %v1302_v5  ;;  %v1318_v21 = vld [vmem:[%s1638_s1 + $0x70] sm:$0xff] (!%p136_p3)   ;;  %v1319_v22 = vld [vmem:[%s1638_s1 + $0xa0] sm:$0xff] (!%p136_p3)   ;;  %v1321_v24 = vld [vmem:[%s1638_s1 + $0xe8] sm:$0xff] (!%p136_p3)  }
   0xe   : > { %1210 = vmatpush3.bf16.msra.mxu1 %v1307_v10  ;;  %s1645_s9 = smov (!%p162_p4, %s1375_s9), 1  ;;  %v1320_v23 = vld [vmem:[%s1638_s1 + $0x30] sm:$0xff]   ;;  %v1322_v25 = vld [vmem:[%s1638_s1 + $0x78] sm:$0xff]   ;;  %v1323_v26 = vld [vmem:[%s1638_s1 + $0xa8] sm:$0xff]  }
   0xf   : > { %1211 = vmatprep.subr.bf16.mxu1 %v1309_v12  ;;  %s1184_s7 = sshll.u32 %s1645_s9, 2  ;;  %v1324_v27 = vld [vmem:[%s1638_s1 + $0x38] sm:$0xff]   ;;  %v1325_v30 = vld [vmem:[%s1638_s1 + $0xf0] sm:$0xff]   ;;  %v1327_v32 = vld [vmem:[%s1638_s1 + $0x140] sm:$0xff]   ;;  %s176_s29 = scalar_lea.vmem %s1639_s2, %s1645_s9 }
  0x10   : > { %1190 = vmatpush3.bf16.msra.mxu0 %v1304_v7  ;;  %s1506_s20 = scalar_lea.vmem %s1637_s0, %s1184_s7  ;;  %v1326_v31 = vld [vmem:[%s1638_s1 + $0xb0] sm:$0xff]   ;;  %v1328_v34 = vld [vmem:[%s1638_s1 + $0x100] sm:$0xff]   ;;  %v1329_v35 = vld [vmem:[%s1638_s1 + $0xf8] sm:$0xff]  }
  0x11   : > { %1191 = vmatprep.subr.bf16.mxu0 %v1306_v9  ;;  %v1018_v28 = vld.sshfl [vmem:[%s1506_s20] sm:$0x11 pattern:$0x76325410]  ;;  %v1330_v36 = vld [vmem:[%s1638_s1 + $0xb8] sm:$0xff]   ;;  %v1331_v37 = vld [vmem:[%s1638_s1 + $0x148] sm:$0xff]  }
  0x12   : > { %1212 = vmatpush3.bf16.msra.mxu1 %v1311_v14  ;;  %v219_v29 = vcombine.high %v1018_v28, %v1018_v28  ;;  %v1332_v38 = vld [vmem:[%s1638_s1 + $0x108] sm:$0xff]   ;;  %v404_v39 = vshrl.u32 %v1018_v28, 16  ;;  %v1333_v40 = vld [vmem:[%s1638_s1 + $0x1c0] sm:$0xff]   ;;  %v1334_v41 = vld [vmem:[%s1638_s1 + $0x150] sm:$0xff]  }
  0x13   : > { %1213 = vmatprep.subr.bf16.mxu1 %v1313_v16  ;;  %v1335_v42 = vld [vmem:[%s1638_s1 + $0x180] sm:$0xff]   ;;  %v1336_v43 = vld [vmem:[%s1638_s1 + $0x110] sm:$0xff]   ;;  %v1337_v44 = vld [vmem:[%s1638_s1 + $0x1c8] sm:$0xff]  }
  0x14   : > { %1192 = vmatpush3.bf16.msra.mxu0 %v1308_v11  ;;  %350 = vmatprep.mubr.bf16.mxu0 %v219_v29  ;;  %v407_v33 = vshrl.u32 %v219_v29, 16  ;;  %v1338_v45 = vld [vmem:[%s1638_s1 + $0x158] sm:$0xff]   ;;  %v1339_v46 = vld [vmem:[%s1638_s1 + $0x188] sm:$0xff]   ;;  %v1341_v48 = vld [vmem:[%s1638_s1 + $0x1d0] sm:$0xff]  }
  0x15   : > { %1193 = vmatprep.subr.bf16.mxu0 %v1310_v13  ;;  %v1340_v47 = vld [vmem:[%s1638_s1 + $0x118] sm:$0xff]   ;;  %v1342_v49 = vld [vmem:[%s1638_s1 + $0x160] sm:$0xff]   ;;  %v1343_v50 = vld [vmem:[%s1638_s1 + $0x190] sm:$0xff]  }
  0x16   : > { %1214 = vmatpush3.bf16.msra.mxu1 %v1315_v18  ;;  %539 = vmatprep.mubr.bf16.mxu1 %v407_v33  ;;  %v1344_v51 = vld [vmem:[%s1638_s1 + $0x120] sm:$0xff]   ;;  %v1345_v52 = vld [vmem:[%s1638_s1 + $0x1d8] sm:$0xff]   ;;  %v1346_v53 = vld [vmem:[%s1638_s1 + $0x168] sm:$0xff]  }
  0x17   : > { %1215 = vmatprep.subr.bf16.mxu1 %v1317_v20  ;;  %v1347_v54 = vld [vmem:[%s1638_s1 + $0x198] sm:$0xff]   ;;  %v1348_v55 = vld [vmem:[%s1638_s1 + $0x128] sm:$0xff]   ;;  %v1349_v56 = vld [vmem:[%s1638_s1 + $0x1e0] sm:$0xff]  }
  0x18   : > { %1194 = vmatpush3.bf16.msra.mxu0 %v1312_v15  ;;  %v1350_v57 = vld [vmem:[%s1638_s1 + $0x170] sm:$0xff]   ;;  %v1351_v58 = vld [vmem:[%s1638_s1 + $0x1a0] sm:$0xff]   ;;  %v1353_v60 = vld [vmem:[%s1638_s1 + $0x1e8] sm:$0xff]  }
  0x19   : > { %1195 = vmatprep.subr.bf16.mxu0 %v1314_v17  ;;  %v1352_v59 = vld [vmem:[%s1638_s1 + $0x130] sm:$0xff]   ;;  %v1354_v61 = vld [vmem:[%s1638_s1 + $0x178] sm:$0xff]   ;;  %v1355_v62 = vld [vmem:[%s1638_s1 + $0x1a8] sm:$0xff]  }
  0x1a   : > { %1216 = vmatpush3.bf16.msra.mxu1 %v1319_v22  ;;  %v1356_v63 = vld [vmem:[%s1638_s1 + $0x138] sm:$0xff]   ;;  %v1116_v0 = vld.sshfl [vmem:[%s1506_s20] sm:$0x22 pattern:$0x76325410]  ;;  %v1357_v3 = vld [vmem:[%s1638_s1 + $0x1f0] sm:$0xff]  }
  0x1b   : > { %1217 = vmatprep.subr.bf16.mxu1 %v1321_v24  ;;  %v592_v1 = vcombine.high %v1116_v0, %v1116_v0  ;;  %v593_v2 = vrot.slane %v1116_v0, 1  ;;  %v1358_v4 = vld [vmem:[%s1638_s1 + $0x1b0] sm:$0xff]   ;;  %v780_v5 = vshrl.u32 %v1116_v0, 16  ;;  %v1359_v7 = vld [vmem:[%s1638_s1 + $0x1f8] sm:$0xff]  }
  0x1c   : > { %1196 = vmatpush3.bf16.msra.mxu0 %v1316_v19  ;;  %v1360_v8 = vld [vmem:[%s1638_s1 + $0x1b8] sm:$0xff]  }
  0x1d   : > { %1197 = vmatprep.subr.bf16.mxu0 %v1318_v21  ;;  %v594_v6 = vrot.slane %v592_v1, 1  ;;  %v784_v9 = vshrl.u32 %v592_v1, 16  ;;  %v782_v11 = vrot.slane %v780_v5, 1 }
  0x1e   : > { %1218 = vmatpush3.bf16.msra.mxu1 %v1323_v26 }
  0x1f   : > { %1219 = vmatprep.subr.bf16.mxu1 %v1325_v30  ;;  %v786_v10 = vrot.slane %v784_v9, 1 }
  0x20   : > { %1198 = vmatpush3.bf16.msra.mxu0 %v1320_v23 }
  0x21   : > { %1199 = vmatprep.subr.bf16.mxu0 %v1322_v25 }
  0x22   : > { %1220 = vmatpush3.bf16.msra.mxu1 %v1326_v31 }
  0x23   : > { %1221 = vmatprep.subr.bf16.mxu1 %v1329_v35 }
  0x24   : > { %1200 = vmatpush3.bf16.msra.mxu0 %v1324_v27 }
  0x25   : > { %1229 = vmatprep.subr.bf16.mxu0 %v1327_v32 }
  0x26   : > { %1222 = vmatpush3.bf16.msra.mxu1 %v1330_v36 }
  0x27   : > { %351 = vmatmul.mubr.bf16.vlgmr.msra.gmra.mrb[0].mxu0 %v1018_v28  ;;  %1251 = vmatprep.subr.bf16.mxu1 %v1333_v40 }
  0x28   : > { %1230 = vmatpush3.bf16.msra.mxu0 %v1328_v34  ;;  %725 = vmatprep.mubr.bf16.mxu0 %v594_v6 }
  0x29   : > { %1231 = vmatprep.subr.bf16.mxu0 %v1331_v37  ;;  %540 = vmatmul.mubr.bf16.vlgmr.msra.gmra.mrb[0].mxu1 %v404_v39 }
  0x2a   : > { %1252 = vmatpush3.bf16.msra.mxu1 %v1335_v42  ;;  %917 = vmatprep.mubr.bf16.mxu1 %v786_v10 }
  0x2b   : > { %1253 = vmatprep.subr.bf16.mxu1 %v1337_v44 }
  0x2c   : > { %1232 = vmatpush3.bf16.msra.mxu0 %v1332_v38 }
  0x2d   : > { %1233 = vmatprep.subr.bf16.mxu0 %v1334_v41 }
  0x2e   : > { %1254 = vmatpush3.bf16.msra.mxu1 %v1339_v46 }
  0x2f   : > { %1255 = vmatprep.subr.bf16.mxu1 %v1341_v48 }
  0x30   : > { %1234 = vmatpush3.bf16.msra.mxu0 %v1336_v43 }
  0x31   : > { %1235 = vmatprep.subr.bf16.mxu0 %v1338_v45 }
  0x32   : > { %1256 = vmatpush3.bf16.msra.mxu1 %v1343_v50 }
  0x33   : > { %1257 = vmatprep.subr.bf16.mxu1 %v1345_v52 }
  0x34   : > { %1236 = vmatpush3.bf16.msra.mxu0 %v1340_v47 }
  0x35   : > { %1237 = vmatprep.subr.bf16.mxu0 %v1342_v49 }
  0x36   : > { %1258 = vmatpush3.bf16.msra.mxu1 %v1347_v54 }
  0x37   : > { %1259 = vmatprep.subr.bf16.mxu1 %v1349_v56 }
  0x38   : > { %1238 = vmatpush3.bf16.msra.mxu0 %v1344_v51 }
  0x39   : > { %1239 = vmatprep.subr.bf16.mxu0 %v1346_v53 }
  0x3a   : > { %1260 = vmatpush3.bf16.msra.mxu1 %v1351_v58 }
  0x3b   : > { %1261 = vmatprep.subr.bf16.mxu1 %v1353_v60 }
  0x3c   : > { %1240 = vmatpush3.bf16.msra.mxu0 %v1348_v55 }
  0x3d   : > { %1241 = vmatprep.subr.bf16.mxu0 %v1350_v57 }
  0x3e   : > { %1262 = vmatpush3.bf16.msra.mxu1 %v1355_v62 }
  0x3f   : > { %1263 = vmatprep.subr.bf16.mxu1 %v1357_v3 }
  0x40   : > { %1242 = vmatpush3.bf16.msra.mxu0 %v1352_v59 }
  0x41   : > { %1243 = vmatprep.subr.bf16.mxu0 %v1354_v61 }
  0x42   : > { %1264 = vmatpush3.bf16.msra.mxu1 %v1358_v4 }
  0x43   : > { %1265 = vmatprep.subr.bf16.mxu1 %v1359_v7 }
  0x44   : > { %1244 = vmatpush3.bf16.msra.mxu0 %v1356_v63 }
  0x46   : > { %1266 = vmatpush3.bf16.msra.mxu1 %v1360_v8 }
  0x47   : > { %726 = vmatmul.mubr.bf16.vlgmr.msra.gmra.mrb[4].mxu0 %v593_v2 }
  0x49   : > { %918 = vmatmul.mubr.bf16.vlgmr.msra.gmra.mrb[4].mxu1 %v782_v11 }
  0xfa   : > { %v1201_v12 = vpop.f32.mrb[0].mxu0 }
  0xfb   : > { %v1202_v13 = vpop.f32.mrb[1].mxu0 }
  0xfc   : > { %v1203_v14 = vadd.f32 %v1202_v13, %v1201_v12  ;;  %v1204_v15 = vpop.f32.mrb[2].mxu0  ;;  %v1223_v17 = vpop.f32.mrb[0].mxu1 }
  0xfd   : > { %v1205_v16 = vpop.f32.mrb[3].mxu0  ;;  %v1224_v18 = vpop.f32.mrb[1].mxu1 }
  0xfe   : > { %358 = vst [vmem:[#allocation2] sm:$0x1] %v1203_v14  ;;  %v1225_v19 = vadd.f32 %v1224_v18, %v1223_v17  ;;  %v1226_v20 = vpop.f32.mrb[2].mxu1 }
  0xff   : > { %v1227_v21 = vpop.f32.mrb[3].mxu1 }
 0x105   : > { %v359_v22 = vld [vmem:[#allocation2] sm:$0x1] }
 0x106   : > { %v547_v23 = vadd.f32 %v1225_v19, %v359_v22 }
 0x108   : > { %548 = vst [vmem:[#allocation2] sm:$0x1] %v547_v23 }
 0x10f   : > { %v549_v28 = vld [vmem:[#allocation2] sm:$0x1] }
 0x11a   : > { %v1245_v24 = vpop.f32.mrb[4].mxu0 }
 0x11b   : > { %v1246_v25 = vpop.f32.mrb[5].mxu0 }
 0x11c   : > { %v1247_v26 = vadd.f32 %v1246_v25, %v1245_v24  ;;  %v1248_v27 = vpop.f32.mrb[6].mxu0  ;;  %v1267_v31 = vpop.f32.mrb[4].mxu1 }
 0x11d   : > { %v1249_v29 = vpop.f32.mrb[7].mxu0  ;;  %v1268_v32 = vpop.f32.mrb[5].mxu1 }
 0x11e   : > { %v733_v30 = vadd.f32 %v1247_v26, %v549_v28  ;;  %v1269_v33 = vadd.f32 %v1268_v32, %v1267_v31  ;;  %v1270_v34 = vpop.f32.mrb[6].mxu1 }
 0x11f   : > { %v1271_v35 = vpop.f32.mrb[7].mxu1 }
 0x120   : > { %734 = vst [vmem:[#allocation2] sm:$0x1] %v733_v30 }
 0x127   : > { %v735_v36 = vld [vmem:[#allocation2] sm:$0x1] }
 0x128   : > { %v925_v37 = vadd.f32 %v1269_v33, %v735_v36 }
 0x12a   : > { %926 = vst [vmem:[#allocation2] sm:$0x1] %v925_v37 }
 0x131   : > { %v927_v38 = vld [vmem:[#allocation2] sm:$0x1] }
 0x132   : > { %928 = vst [vmem:[%s176_s29] sm:$0x1] %v927_v38 }
 0x133 PF: > { %s12_s11 = sadd.s32 1, %s1383_s11   ;;  %s1640_s9 = smov %s1379_s10 }
 0x134   : > { %p9_p5 = scmp.ge.s32.totalorder %s12_s11, 4   ;;  %s1641_s10 = smov %s1643_s12 }
 0x136   :  { %11 = sbr.rel (!%p9_p5) target bundleno = 2 (0x2), region = 64 }

</bundles_post_ra>
